<compile_context>
chip_gen: v6e
topology: v6e:2x2x1
jax: 0.10.0
libtpu: 0.0.40
codegen_flags: <defaults>
</compile_context>

<pallas_src>
import functools

import jax
import jax.numpy as jnp
from jax import lax
from jax.experimental import pallas as pl
from jax.experimental.pallas import tpu as pltpu


TASKS = ("lemmas", "upos", "deps", "feats")   # lemmas=0, upos=1, deps=2, feats=3
_NEG = -1e30                                  # padded-vocab logit; exp() underflows to 0


# ----------------------------------------------------------------------------
# tiling / budget helpers
# ----------------------------------------------------------------------------
def _round_up(x, m):
    return ((x + m - 1) // m) * m


def _row_tile(n, max_tile=512):
    """Row tile: multiple of 16 (bf16 sublane packing), <= 512, >= 2 grid steps
    whenever the row count allows (v7x megacore + DMA/compute pipelining)."""
    tm = min(max_tile, _round_up(n, 16))
    if n >= 32:
        tm = min(tm, _round_up((n + 1) // 2, 16))
    return max(16, tm)


def _batch_block(b, t, max_rows=512):
    """Sentences per biaffine grid step; keeps >= 2 grid steps when b allows."""
    best = 1
    for d in range(1, b + 1):
        if b % d == 0 and d * t <= max_rows and (b // d >= 2 or b == 1):
            best = d
    return best


def _vmem_limit():
    """Scoped-VMEM budget per generation: ~75% of physical, capped at 96 MiB
    (v5e/v6e: 96 MiB; v7x (64 MiB physical): 48 MiB)."""
    try:
        cap = pltpu.get_tpu_info().vmem_capacity_bytes
    except Exception:
        cap = 64 * 1024 * 1024
    return int(min(96 * 1024 * 1024, max(32 * 1024 * 1024, cap * 3 // 4)))


# ----------------------------------------------------------------------------
# Fused backbone kernel:
#   encoder layers -> folded-mix wide head GEMM -> tag log-softmax -> deps MLP
#   -> biaffine side projections -> two lane-dense output slabs
# ----------------------------------------------------------------------------
def _backbone_kernel(
    x_ref,                   # [TM, H] f32 embedded tokens (row tile)
    ew_ref, eb_ref,          # [L, H, H] bf16, [L, 1, H] f32 synthetic encoder
    wf_ref,                  # [L, H, NT] bf16  folded (mix * head) weights per layer
    bias_ref,                # [1, NT] f32      concatenated head biases (+ -1e30 vocab pad)
    warc_m_ref, warc_b_ref,  # arc biaffine dep side: [K_A, K_A] bf16, [1, K_A] f32
    wrel_m_ref, wrel_b_ref,  # rel biaffine head side: [K_R, Rl*K_R] bf16, [1, Rl*K_R] f32
    tags_o,                  # [TM, 3*128-ish] f32 lane-dense tag log-prob slab
    bio_o,                   # [TM, W_bio] bf16 lane-dense biaffine-operand slab
    *, num_layers, tag_segs, dep_off, k_arc, k_rel, bio_pad):
    f32, bf16 = jnp.float32, jnp.bfloat16
    tm = x_ref.shape[0]
    nt = wf_ref.shape[2]

    # ---- encoder: L fused tanh-linear layers.  The scalar mix is folded into
    # wf_ref, so each layer output feeds ONE wide MXU pass and is freed
    # immediately (no live L-layer stack, no per-task VPU mix chains).
    h = x_ref[...].astype(bf16)
    acc = jnp.zeros((tm, nt), f32)
    for l in range(num_layers):
        h = jnp.tanh(jnp.dot(h, ew_ref[l], preferred_element_type=f32)
                     + eb_ref[l]).astype(bf16)
        acc = acc + jnp.dot(h, wf_ref[l], preferred_element_type=f32)
    acc = acc + bias_ref[...]

    # ---- tag heads: each in its own 128-aligned lane block; log_softmax in f32.
    # Padded vocab columns carry a -1e30 bias so they never affect max / sum.
    def log_softmax(z):
        z = z - jnp.max(z, axis=-1, keepdims=True)
        return z - jnp.log(jnp.sum(jnp.exp(z), axis=-1, keepdims=True))

    tags_o[...] = jnp.concatenate(
        [log_softmax(acc[:, off:off + width]) for off, width in tag_segs], axis=-1)

    # ---- deps: fused 4-way MLP epilogue [arc_h | arc_d | rel_h | rel_d+ones]
    dep = acc[:, dep_off:dep_off + 2 * k_arc + 2 * k_rel]
    dep = jnp.where(dep > 0, dep, 0.1 * dep)                   # LeakyReLU(0.1)
    arc_h = dep[:, 0:k_arc]
    arc_d = dep[:, k_arc:2 * k_arc]
    rel_h = dep[:, 2 * k_arc:2 * k_arc + k_rel]
    rel_d = dep[:, 2 * k_arc + k_rel:2 * k_arc + 2 * k_rel]    # includes the "ones" slot

    # dep-side arc projection ([arc_d, 1] @ W_arc; bias_x handled by the bias row)
    dw_arc = jnp.dot(arc_d.astype(bf16), warc_m_ref[...],
                     preferred_element_type=f32) + warc_b_ref[...]
    # head-side rel projection against ALL labels at once ([rel_h, 1] @ W_rel)
    hw_rel = jnp.dot(rel_h.astype(bf16), wrel_m_ref[...],
                     preferred_element_type=f32) + wrel_b_ref[...]

    # ---- single lane-dense bf16 slab for the biaffine kernel (halves HBM handoff).
    # NOTE: computing hw_rel here (not in the biaffine kernel) avoids an in-kernel
    # lane-splitting reshape; the bf16 handoff keeps the extra traffic modest.
    parts = [arc_h, dw_arc, rel_d, hw_rel]
    if bio_pad:
        parts.append(jnp.zeros((tm, bio_pad), f32))
    bio_o[...] = jnp.concatenate(parts, axis=-1).astype(bf16)


def run_backbone(x, enc_w, enc_b, w_fold, bias_all,
                 warc_m, warc_b, wrel_m, wrel_b, dims):
    N, H = x.shape
    (L, tag_segs, dep_off, k_arc, k_rel, tags_w, bio_w, bio_pad) = dims

    TM = _row_tile(N)
    N_pad = _round_up(N, TM)
    if N_pad != N:
        x = jnp.pad(x, ((0, N_pad - N), (0, 0)))
    grid = (N_pad // TM,)

    def row_spec(cols):
        return pl.BlockSpec((TM, cols), lambda i: (i, 0))

    def const_spec(shape):
        nd = len(shape)
        return pl.BlockSpec(shape, lambda i, _nd=nd: (0,) * _nd)

    kernel = functools.partial(
        _backbone_kernel, num_layers=L, tag_segs=tag_segs, dep_off=dep_off,
        k_arc=k_arc, k_rel=k_rel, bio_pad=bio_pad)

    # TODO(synk): on v7x, constant-index weight inputs could additionally be
    # single-buffered (pipeline_mode=pl.Buffered(1)) to halve their VMEM footprint.
    tags, bio = pl.pallas_call(
        kernel,
        out_shape=(jax.ShapeDtypeStruct((N_pad, tags_w), jnp.float32),
                   jax.ShapeDtypeStruct((N_pad, bio_w), jnp.bfloat16)),
        grid=grid,
        in_specs=[
            row_spec(H),
            const_spec(enc_w.shape), const_spec(enc_b.shape),
            const_spec(w_fold.shape), const_spec(bias_all.shape),
            const_spec(warc_m.shape), const_spec(warc_b.shape),
            const_spec(wrel_m.shape), const_spec(wrel_b.shape),
        ],
        out_specs=(row_spec(tags_w), row_spec(bio_w)),
        compiler_params=pltpu.CompilerParams(
            dimension_semantics=("parallel",),
            vmem_limit_bytes=_vmem_limit()),
    )(x, enc_w, enc_b, w_fold, bias_all, warc_m, warc_b, wrel_m, wrel_b)
    return tags[:N], bio[:N]


# ----------------------------------------------------------------------------
# Fused biaffine kernel: per-sentence pairwise contractions + fused -inf mask
# ----------------------------------------------------------------------------
def _biaffine_kernel(arch_ref, dwarc_ref, reld_ref, hw_ref, mask_ref,
                     arc_o_ref, rel_o_ref, *, block_batch):
    f32 = jnp.float32
    for b in range(block_batch):                         # small, unrolled
        # s_arc[i, j] = ([arc_d, 1] @ W_arc)[i, :] . arc_h[j, :]   (bf16 MXU, f32 acc)
        s_arc = lax.dot_general(dwarc_ref[b], arch_ref[b],
                                (((1,), (1,)), ((), ())), preferred_element_type=f32)
        # masked_fill_(~mask, -inf) over head positions, fused into the write.
        # NOTE: a fully padded (length-0) sentence would make downstream softmax
        # NaN, exactly like the reference masked_fill with -inf.
        arc_o_ref[b] = jnp.where(mask_ref[b] > 0.5, s_arc, -jnp.inf)
        # s_rel_flat[i, j*Rl + r] = [rel_d, 1][i, :] . hw[j*Rl + r, :]
        rel_o_ref[b] = lax.dot_general(reld_ref[b], hw_ref[b],
                                       (((1,), (1,)), ((), ())),
                                       preferred_element_type=f32)


def run_biaffine(arc_h, dw_arc, rel_d, hw_rel, mask_f):
    B, T, KA = arc_h.shape
    KR = rel_d.shape[-1]
    TRl = hw_rel.shape[1]

    Bb = _batch_block(B, T)
    grid = (B // Bb,)

    return pl.pallas_call(
        functools.partial(_biaffine_kernel, block_batch=Bb),
        out_shape=(
            jax.ShapeDtypeStruct((B, T, T), jnp.float32),     # s_arc
            jax.ShapeDtypeStruct((B, T, TRl), jnp.float32),   # s_rel (flat, lane-dense)
        ),
        grid=grid,
        in_specs=[
            pl.BlockSpec((Bb, T, KA), lambda i: (i, 0, 0)),
            pl.BlockSpec((Bb, T, KA), lambda i: (i, 0, 0)),
            pl.BlockSpec((Bb, T, KR), lambda i: (i, 0, 0)),
            pl.BlockSpec((Bb, TRl, KR), lambda i: (i, 0, 0)),
            pl.BlockSpec((Bb, 1, T), lambda i: (i, 0, 0)),
        ],
        out_specs=(
            pl.BlockSpec((Bb, T, T), lambda i: (i, 0, 0)),
            pl.BlockSpec((Bb, T, TRl), lambda i: (i, 0, 0)),
        ),
        compiler_params=pltpu.CompilerParams(
            dimension_semantics=("parallel",),
            vmem_limit_bytes=_vmem_limit()),
    )(arc_h, dw_arc, rel_d, hw_rel, mask_f)


# ----------------------------------------------------------------------------
# Parameter init (deterministic, synthetic)
# ----------------------------------------------------------------------------
def init_params(key, cfg):
    H, L = cfg["hidden_size"], cfg["mix_embedding"]
    A, R = cfg["n_mlp_arc"], cfg["n_mlp_rel"]

    def nrm(k, shape, scale=0.05):
        return scale * jax.random.normal(k, shape, jnp.float32)

    keys = iter(jax.random.split(key, 64))
    params = {}

    # TODO(synk): ContextualWordEmbeddingModule is a pretrained transformer; replaced by a
    # synthetic embedding lookup + L tanh-linear layers so the Pallas matmul path is exercised.
    params["encoder"] = {
        "embedding": nrm(next(keys), (cfg["vocab_size"], H), 0.1),
        "layers": [{"w": nrm(next(keys), (H, H)), "b": nrm(next(keys), (H,))}
                   for _ in range(L)],
    }

    # per-task scalar mix (ScalarMixWithDropout, do_layer_norm=False)
    params["scalar_mix"] = {
        t: {"scalars": nrm(next(keys), (L,), 0.1), "gamma": jnp.float32(1.0)}
        for t in TASKS
    }

    # TagDecoders (lemmas / upos / feats)
    params["tags"] = {}
    for t, n in (("lemmas", cfg["num_lemmas"]),
                 ("upos", cfg["num_upos"]),
                 ("feats", cfg["num_feats"])):
        params["tags"][t] = {"w": nrm(next(keys), (H, n)), "b": nrm(next(keys), (n,))}

    # BiaffineDecoder
    params["deps"] = {
        "mlp_arc_h_w": nrm(next(keys), (H, A)), "mlp_arc_h_b": nrm(next(keys), (A,)),
        "mlp_arc_d_w": nrm(next(keys), (H, A)), "mlp_arc_d_b": nrm(next(keys), (A,)),
        "mlp_rel_h_w": nrm(next(keys), (H, R)), "mlp_rel_h_b": nrm(next(keys), (R,)),
        "mlp_rel_d_w": nrm(next(keys), (H, R)), "mlp_rel_d_b": nrm(next(keys), (R,)),
        "w_arc": nrm(next(keys), (A + 1, A)),                       # bias_x=True, bias_y=False
        "w_rel": nrm(next(keys), (cfg["num_rels"], R + 1, R + 1)),  # bias_x=bias_y=True
    }
    return params


# ----------------------------------------------------------------------------
# Forward pass (UniversalDependenciesModel.forward, eval mode, no gold labels)
# ----------------------------------------------------------------------------
def ud_model_forward(params, batch, mask, cfg):
    tokens = batch["token_ids"]                 # [B, T]
    B, T = tokens.shape
    H = cfg["hidden_size"]
    L = cfg["mix_embedding"]
    A, R, Rl = cfg["n_mlp_arc"], cfg["n_mlp_rel"], cfg["num_rels"]
    n_lem, n_up, n_ft = cfg["num_lemmas"], cfg["num_upos"], cfg["num_feats"]
    N = B * T

    # hardware-friendly padded widths
    K_A = _round_up(A, 16)                      # arc contracting dim (bf16 packing)
    K_R = _round_up(R + 1, 16)                  # rel contracting dim incl. the ones slot
    P_lem, P_up, P_ft = (_round_up(n, 128) for n in (n_lem, n_up, n_ft))
    P_dep = _round_up(2 * K_A + 2 * K_R, 128)
    dep_off = P_lem + P_up + P_ft
    NT = dep_off + P_dep
    tags_w = dep_off
    tag_segs = ((0, P_lem), (P_lem, P_up), (P_lem + P_up, P_ft))
    bio_real = 2 * K_A + K_R + Rl * K_R
    bio_w = _round_up(bio_real, 128)
    bio_pad = bio_w - bio_real

    # --- encoder input: embedding lookup stays at the XLA level (gather) ---
    x = jnp.take(params["encoder"]["embedding"], tokens.reshape(-1), axis=0)    # [N, H]

    # --- XLA-level weight prep: fold scalar mix into per-layer wide head weights ---
    alphas = jnp.stack(
        [jax.nn.softmax(params["scalar_mix"][t]["scalars"]) * params["scalar_mix"][t]["gamma"]
         for t in TASKS], axis=0)                                                # [4, L]

    tag = params["tags"]
    dp = params["deps"]

    def padc(w, width):
        return jnp.pad(w, ((0, 0), (0, width - w.shape[1])))

    def padb(b, width, fill=0.0):
        return jnp.concatenate([b, jnp.full((width - b.shape[0],), fill, jnp.float32)])

    # unscaled concatenated head weight [H, NT]:
    #   [lemmas | upos | feats | arc_h, arc_d, rel_h, rel_d (deps MLP)]
    dep_w = jnp.concatenate(
        [padc(dp["mlp_arc_h_w"], K_A), padc(dp["mlp_arc_d_w"], K_A),
         padc(dp["mlp_rel_h_w"], K_R), padc(dp["mlp_rel_d_w"], K_R)], axis=1)
    w_head = jnp.concatenate(
        [padc(tag["lemmas"]["w"], P_lem), padc(tag["upos"]["w"], P_up),
         padc(tag["feats"]["w"], P_ft), padc(dep_w, P_dep)], axis=1)             # [H, NT]

    # concatenated biases; padded tag-vocab columns get -1e30 (log-softmax safe);
    # the rel_d "ones" slot gets bias 1 with a zero weight column (LeakyReLU(1)=1).
    rel_d_bias = jnp.concatenate(
        [dp["mlp_rel_d_b"], jnp.ones((1,), jnp.float32),
         jnp.zeros((K_R - R - 1,), jnp.float32)])
    dep_b = jnp.concatenate(
        [padb(dp["mlp_arc_h_b"], K_A), padb(dp["mlp_arc_d_b"], K_A),
         padb(dp["mlp_rel_h_b"], K_R), rel_d_bias])
    bias_all = jnp.concatenate(
        [padb(tag["lemmas"]["b"], P_lem, _NEG), padb(tag["upos"]["b"], P_up, _NEG),
         padb(tag["feats"]["b"], P_ft, _NEG), padb(dep_b, P_dep)]).reshape(1, NT)

    # per-layer folded weight: alpha[task, l] * W_task (scalar mix fused into the GEMM)
    seg_alpha = jnp.concatenate(
        [jnp.broadcast_to(alphas[0][:, None], (L, P_lem)),
         jnp.broadcast_to(alphas[1][:, None], (L, P_up)),
         jnp.broadcast_to(alphas[3][:, None], (L, P_ft)),
         jnp.broadcast_to(alphas[2][:, None], (L, P_dep))], axis=1)              # [L, NT]
    w_fold = (w_head[None, :, :] * seg_alpha[:, None, :]).astype(jnp.bfloat16)   # [L, H, NT]

    enc_w = jnp.stack([l["w"] for l in params["encoder"]["layers"]], 0).astype(jnp.bfloat16)
    enc_b = jnp.stack([l["b"] for l in params["encoder"]["layers"]], 0).reshape(L, 1, H)

    # arc biaffine (dep side), zero-padded to K_A
    warc_m = jnp.pad(dp["w_arc"][:A, :], ((0, K_A - A), (0, K_A - A))).astype(jnp.bfloat16)
    warc_b = jnp.pad(dp["w_arc"][A:, :], ((0, 0), (0, K_A - A)))                  # [1, K_A]
    # rel biaffine (head side), all labels flattened: W[k, r*K_R + m] = w_rel[r, m, k]
    w_rel_t = jnp.pad(jnp.transpose(dp["w_rel"], (2, 0, 1)),
                      ((0, 0), (0, 0), (0, K_R - (R + 1))))                       # [R+1, Rl, K_R]
    w_rel_flat = w_rel_t.reshape(R + 1, Rl * K_R)
    wrel_m = jnp.pad(w_rel_flat[:R], ((0, K_R - R), (0, 0))).astype(jnp.bfloat16)
    wrel_b = w_rel_flat[R:R + 1]                                                  # [1, Rl*K_R]

    # --- fused backbone kernel ---
    dims = (L, tag_segs, dep_off, K_A, K_R, tags_w, bio_w, bio_pad)
    tags, bio = run_backbone(x, enc_w, enc_b, w_fold, bias_all,
                             warc_m, warc_b, wrel_m, wrel_b, dims)

    # slice the lane-dense slabs apart (cheap XLA copies at small widths)
    lem_lp = tags[:, 0:n_lem].reshape(B, T, n_lem)
    up_lp = tags[:, P_lem:P_lem + n_up].reshape(B, T, n_up)
    ft_lp = tags[:, P_lem + P_up:P_lem + P_up + n_ft].reshape(B, T, n_ft)

    arc_h = bio[:, 0:K_A].reshape(B, T, K_A)
    dw_arc = bio[:, K_A:2 * K_A].reshape(B, T, K_A)
    rel_d = bio[:, 2 * K_A:2 * K_A + K_R].reshape(B, T, K_R)
    hw_rel = bio[:, 2 * K_A + K_R:2 * K_A + K_R + Rl * K_R].reshape(B, T * Rl, K_R)
    mask_f = mask.astype(jnp.float32).reshape(B, 1, T)

    # --- fused arc/rel biaffine kernel (mask fused into the arc write) ---
    s_arc, s_rel_flat = run_biaffine(arc_h, dw_arc, rel_d, hw_rel, mask_f)
    s_rel = s_rel_flat.reshape(B, T, T, Rl)          # free reshape -> [B, T_dep, T_head, R]

    # mask_without_root (mask[:, 0] = False) only feeds the training losses.
    # TODO(synk): label-smoothed CE for tags and arc/rel CE for deps omitted: the batch
    # carries no gold labels ('arc' is None), matching the no-loss branch of forward().
    # TODO(synk): AdaptiveLogSoftmaxWithLoss (adaptive=True) replaced by a dense head +
    # full log-softmax; at realistic vocab sizes the tag heads must be tiled over the
    # vocab dimension instead of kept const-resident in VMEM.
    logits = {}
    class_probabilities = {
        "lemmas": lem_lp,
        "upos": up_lp,
        "feats": ft_lp,
        "deps": {"s_arc": s_arc, "s_rel": s_rel},
    }
    return {"logits": logits, "class_probabilities": class_probabilities}


# ----------------------------------------------------------------------------
if __name__ == "__main__":
    cfg = dict(
        hidden_size=32,
        mix_embedding=4,     # module default is 13; small for the demo
        n_mlp_arc=16,
        n_mlp_rel=8,
        num_rels=6,
        num_lemmas=10,
        num_upos=7,
        num_feats=9,
        vocab_size=50,
    )
    B, T = 2, 8

    key = jax.random.PRNGKey(0)
    k_param, k_tok = jax.random.split(key)
    params = init_params(k_param, cfg)

    token_ids = jax.random.randint(k_tok, (B, T), 0, cfg["vocab_size"], dtype=jnp.int32)
    lengths = jnp.array([8, 6], dtype=jnp.int32)
    mask = jnp.arange(T)[None, :] < lengths[:, None]          # bool [B, T]

    fwd = jax.jit(functools.partial(ud_model_forward, cfg=cfg))
    out = fwd(params, {"token_ids": token_ids}, mask)
    jax.tree_util.tree_map(jax.block_until_ready, out)

    cp = out["class_probabilities"]
    assert cp["lemmas"].shape == (B, T, cfg["num_lemmas"])
    assert cp["upos"].shape == (B, T, cfg["num_upos"])
    assert cp["feats"].shape == (B, T, cfg["num_feats"])
    assert cp["deps"]["s_arc"].shape == (B, T, T)
    assert cp["deps"]["s_rel"].shape == (B, T, T, cfg["num_rels"])
    # padded head positions of sentence 1 (length 6) are -inf (fused mask)
    assert bool(jnp.all(jnp.isneginf(cp["deps"]["s_arc"][1, :, 6:])))
    assert bool(jnp.all(jnp.isfinite(cp["deps"]["s_arc"][:, :, :6])))
    assert bool(jnp.all(jnp.isfinite(cp["deps"]["s_rel"])))
    # tag heads emit normalized log-probabilities
    assert bool(jnp.allclose(jnp.exp(cp["upos"]).sum(-1), 1.0, atol=1e-3))

    print("KERNEL_OK")
</pallas_src>

<mosaic_0001>
module attributes {stable_mosaic.version = 11 : i64} {
  func.func @_biaffine_kernel(%arg0: i32, %arg1: memref<1x8x16xbf16, #tpu.memory_space<vmem>>, %arg2: memref<1x8x16xbf16, #tpu.memory_space<vmem>>, %arg3: memref<1x8x16xbf16, #tpu.memory_space<vmem>>, %arg4: memref<1x48x16xbf16, #tpu.memory_space<vmem>>, %arg5: memref<1x1x8xf32, #tpu.memory_space<vmem>>, %arg6: memref<1x8x8xf32, #tpu.memory_space<vmem>>, %arg7: memref<1x8x48xf32, #tpu.memory_space<vmem>>) attributes {dimension_semantics = [#tpu.dimension_semantics<parallel>], iteration_bounds = array<i64: 2>, scalar_prefetch = 0 : i64, scratch_operands = 0 : i64, tpu.core_type = #tpu.core_type<tc>, window_params = [{transform_indices = @transform_0, window_bounds = array<i64: 1, 8, 16>}, {transform_indices = @transform_1, window_bounds = array<i64: 1, 8, 16>}, {transform_indices = @transform_2, window_bounds = array<i64: 1, 8, 16>}, {transform_indices = @transform_3, window_bounds = array<i64: 1, 48, 16>}, {transform_indices = @transform_4, window_bounds = array<i64: 1, 1, 8>}, {transform_indices = @transform_5, window_bounds = array<i64: 1, 8, 8>}, {transform_indices = @transform_6, window_bounds = array<i64: 1, 8, 48>}]} {
    %c0 = arith.constant 0 : index
    %c0_0 = arith.constant 0 : index
    %c0_1 = arith.constant 0 : index
    %0 = vector.load %arg2[%c0, %c0_0, %c0_1] : memref<1x8x16xbf16, #tpu.memory_space<vmem>>, vector<1x8x16xbf16>
    %1 = vector.shape_cast %0 : vector<1x8x16xbf16> to vector<8x16xbf16>
    %c0_2 = arith.constant 0 : index
    %c0_3 = arith.constant 0 : index
    %c0_4 = arith.constant 0 : index
    %2 = vector.load %arg1[%c0_2, %c0_3, %c0_4] : memref<1x8x16xbf16, #tpu.memory_space<vmem>>, vector<1x8x16xbf16>
    %3 = vector.shape_cast %2 : vector<1x8x16xbf16> to vector<8x16xbf16>
    %cst = arith.constant dense<0.000000e+00> : vector<8x8xf32>
    %4 = tpu.matmul %1, %3, %cst {dimension_numbers = #tpu.dot_dimension_numbers<[1], [1], [0], [0], [0, 0, 1, 0], [], []>} : vector<8x16xbf16>, vector<8x16xbf16>, vector<8x8xf32> -> vector<8x8xf32>
    %c0_5 = arith.constant 0 : index
    %c0_6 = arith.constant 0 : index
    %c0_7 = arith.constant 0 : index
    %5 = vector.load %arg5[%c0_5, %c0_6, %c0_7] : memref<1x1x8xf32, #tpu.memory_space<vmem>>, vector<1x1x8xf32>
    %6 = vector.shape_cast %5 : vector<1x1x8xf32> to vector<1x8xf32>
    %cst_8 = arith.constant 5.000000e-01 : f32
    %7 = vector.broadcast %cst_8 : f32 to vector<1x8xf32>
    %8 = arith.cmpf ogt, %6, %7 : vector<1x8xf32>
    %cst_9 = arith.constant 0xFF800000 : f32
    %9 = vector.shape_cast %8 : vector<1x8xi1> to vector<1x8xi1>
    %10 = vector.broadcast %9 : vector<1x8xi1> to vector<8x8xi1>
    %11 = vector.broadcast %cst_9 : f32 to vector<8x8xf32>
    %12 = arith.select %10, %4, %11 : vector<8x8xi1>, vector<8x8xf32>
    %c0_10 = arith.constant 0 : index
    %c0_11 = arith.constant 0 : index
    %c0_12 = arith.constant 0 : index
    %13 = vector.load %arg6[%c0_10, %c0_11, %c0_12] : memref<1x8x8xf32, #tpu.memory_space<vmem>>, vector<1x8x8xf32>
    %14 = vector.shape_cast %13 : vector<1x8x8xf32> to vector<8x8xf32>
    %15 = vector.shape_cast %12 : vector<8x8xf32> to vector<1x8x8xf32>
    tpu.vector_store %arg6[%c0_10, %c0_11, %c0_12], %15 {strides = array<i32>} : memref<1x8x8xf32, #tpu.memory_space<vmem>>, vector<1x8x8xf32>,
    %c0_13 = arith.constant 0 : index
    %c0_14 = arith.constant 0 : index
    %c0_15 = arith.constant 0 : index
    %16 = vector.load %arg3[%c0_13, %c0_14, %c0_15] : memref<1x8x16xbf16, #tpu.memory_space<vmem>>, vector<1x8x16xbf16>
    %17 = vector.shape_cast %16 : vector<1x8x16xbf16> to vector<8x16xbf16>
    %c0_16 = arith.constant 0 : index
    %c0_17 = arith.constant 0 : index
    %c0_18 = arith.constant 0 : index
    %18 = vector.load %arg4[%c0_16, %c0_17, %c0_18] : memref<1x48x16xbf16, #tpu.memory_space<vmem>>, vector<1x48x16xbf16>
    %19 = vector.shape_cast %18 : vector<1x48x16xbf16> to vector<48x16xbf16>
    %cst_19 = arith.constant dense<0.000000e+00> : vector<8x48xf32>
    %20 = tpu.matmul %17, %19, %cst_19 {dimension_numbers = #tpu.dot_dimension_numbers<[1], [1], [0], [0], [0, 0, 1, 0], [], []>} : vector<8x16xbf16>, vector<48x16xbf16>, vector<8x48xf32> -> vector<8x48xf32>
    %c0_20 = arith.constant 0 : index
    %c0_21 = arith.constant 0 : index
    %c0_22 = arith.constant 0 : index
    %21 = vector.load %arg7[%c0_20, %c0_21, %c0_22] : memref<1x8x48xf32, #tpu.memory_space<vmem>>, vector<1x8x48xf32>
    %22 = vector.shape_cast %21 : vector<1x8x48xf32> to vector<8x48xf32>
    %23 = vector.shape_cast %20 : vector<8x48xf32> to vector<1x8x48xf32>
    tpu.vector_store %arg7[%c0_20, %c0_21, %c0_22], %23 {strides = array<i32>} : memref<1x8x48xf32, #tpu.memory_space<vmem>>, vector<1x8x48xf32>,
    return
  }
  func.func @transform_0(%arg0: i32) -> (i32, i32, i32) {
    %c0_i32 = arith.constant 0 : i32
    %c0_i32_0 = arith.constant 0 : i32
    %c0_i32_1 = arith.constant 0 : i32
    return %arg0, %c0_i32, %c0_i32_0 : i32, i32, i32
  }
  func.func @transform_1(%arg0: i32) -> (i32, i32, i32) {
    %c0_i32 = arith.constant 0 : i32
    %c0_i32_0 = arith.constant 0 : i32
    %c0_i32_1 = arith.constant 0 : i32
    return %arg0, %c0_i32, %c0_i32_0 : i32, i32, i32
  }
  func.func @transform_2(%arg0: i32) -> (i32, i32, i32) {
    %c0_i32 = arith.constant 0 : i32
    %c0_i32_0 = arith.constant 0 : i32
    %c0_i32_1 = arith.constant 0 : i32
    return %arg0, %c0_i32, %c0_i32_0 : i32, i32, i32
  }
  func.func @transform_3(%arg0: i32) -> (i32, i32, i32) {
    %c0_i32 = arith.constant 0 : i32
    %c0_i32_0 = arith.constant 0 : i32
    %c0_i32_1 = arith.constant 0 : i32
    return %arg0, %c0_i32, %c0_i32_0 : i32, i32, i32
  }
  func.func @transform_4(%arg0: i32) -> (i32, i32, i32) {
    %c0_i32 = arith.constant 0 : i32
    %c0_i32_0 = arith.constant 0 : i32
    %c0_i32_1 = arith.constant 0 : i32
    return %arg0, %c0_i32, %c0_i32_0 : i32, i32, i32
  }
  func.func @transform_5(%arg0: i32) -> (i32, i32, i32) {
    %c0_i32 = arith.constant 0 : i32
    %c0_i32_0 = arith.constant 0 : i32
    %c0_i32_1 = arith.constant 0 : i32
    return %arg0, %c0_i32, %c0_i32_0 : i32, i32, i32
  }
  func.func @transform_6(%arg0: i32) -> (i32, i32, i32) {
    %c0_i32 = arith.constant 0 : i32
    %c0_i32_0 = arith.constant 0 : i32
    %c0_i32_1 = arith.constant 0 : i32
    return %arg0, %c0_i32, %c0_i32_0 : i32, i32, i32
  }
}

module attributes {stable_mosaic.version = 11 : i64} {
  func.func @_backbone_kernel(%arg0: i32, %arg1: memref<16x32xf32, #tpu.memory_space<vmem>>, %arg2: memref<4x32x32xbf16, #tpu.memory_space<vmem>>, %arg3: memref<4x1x32xf32, #tpu.memory_space<vmem>>, %arg4: memref<4x32x512xbf16, #tpu.memory_space<vmem>>, %arg5: memref<1x512xf32, #tpu.memory_space<vmem>>, %arg6: memref<16x16xbf16, #tpu.memory_space<vmem>>, %arg7: memref<1x16xf32, #tpu.memory_space<vmem>>, %arg8: memref<16x96xbf16, #tpu.memory_space<vmem>>, %arg9: memref<1x96xf32, #tpu.memory_space<vmem>>, %arg10: memref<16x384xf32, #tpu.memory_space<vmem>>, %arg11: memref<16x256xbf16, #tpu.memory_space<vmem>>) attributes {dimension_semantics = [#tpu.dimension_semantics<parallel>], iteration_bounds = array<i64: 1>, scalar_prefetch = 0 : i64, scratch_operands = 0 : i64, tpu.core_type = #tpu.core_type<tc>, window_params = [{transform_indices = @transform_0, window_bounds = array<i64: 16, 32>}, {pipeline_mode = #tpu.pipeline_mode<synchronous>, transform_indices = @transform_1, window_bounds = array<i64: 4, 32, 32>}, {pipeline_mode = #tpu.pipeline_mode<synchronous>, transform_indices = @transform_2, window_bounds = array<i64: 4, 1, 32>}, {pipeline_mode = #tpu.pipeline_mode<synchronous>, transform_indices = @transform_3, window_bounds = array<i64: 4, 32, 512>}, {pipeline_mode = #tpu.pipeline_mode<synchronous>, transform_indices = @transform_4, window_bounds = array<i64: 1, 512>}, {pipeline_mode = #tpu.pipeline_mode<synchronous>, transform_indices = @transform_5, window_bounds = array<i64: 16, 16>}, {pipeline_mode = #tpu.pipeline_mode<synchronous>, transform_indices = @transform_6, window_bounds = array<i64: 1, 16>}, {pipeline_mode = #tpu.pipeline_mode<synchronous>, transform_indices = @transform_7, window_bounds = array<i64: 16, 96>}, {pipeline_mode = #tpu.pipeline_mode<synchronous>, transform_indices = @transform_8, window_bounds = array<i64: 1, 96>}, {transform_indices = @transform_9, window_bounds = array<i64: 16, 384>}, {transform_indices = @transform_10, window_bounds = array<i64: 16, 256>}]} {
    %c0 = arith.constant 0 : index
    %c0_0 = arith.constant 0 : index
    %0 = vector.load %arg1[%c0, %c0_0] : memref<16x32xf32, #tpu.memory_space<vmem>>, vector<16x32xf32>
    %1 = arith.truncf %0 : vector<16x32xf32> to vector<16x32xbf16>
    %cst = arith.constant 0.000000e+00 : f32
    %2 = vector.broadcast %cst : f32 to vector<16x512xf32>
    %c0_1 = arith.constant 0 : index
    %c0_2 = arith.constant 0 : index
    %c0_3 = arith.constant 0 : index
    %3 = vector.load %arg2[%c0_1, %c0_2, %c0_3] : memref<4x32x32xbf16, #tpu.memory_space<vmem>>, vector<1x32x32xbf16>
    %4 = vector.shape_cast %3 : vector<1x32x32xbf16> to vector<32x32xbf16>
    %cst_4 = arith.constant dense<0.000000e+00> : vector<16x32xf32>
    %5 = tpu.matmul %1, %4, %cst_4 {dimension_numbers = #tpu.dot_dimension_numbers<[1], [0], [0], [1], [0, 0, 1, 1], [], []>} : vector<16x32xbf16>, vector<32x32xbf16>, vector<16x32xf32> -> vector<16x32xf32>
    %c0_5 = arith.constant 0 : index
    %c0_6 = arith.constant 0 : index
    %c0_7 = arith.constant 0 : index
    %6 = vector.load %arg3[%c0_5, %c0_6, %c0_7] : memref<4x1x32xf32, #tpu.memory_space<vmem>>, vector<1x1x32xf32>
    %7 = vector.shape_cast %6 : vector<1x1x32xf32> to vector<1x32xf32>
    %8 = vector.broadcast %7 : vector<1x32xf32> to vector<16x32xf32>
    %9 = arith.addf %5, %8 : vector<16x32xf32>
    %10 = math.tanh %9 : vector<16x32xf32>
    %11 = arith.truncf %10 : vector<16x32xf32> to vector<16x32xbf16>
    %c0_8 = arith.constant 0 : index
    %c0_9 = arith.constant 0 : index
    %c0_10 = arith.constant 0 : index
    %12 = vector.load %arg4[%c0_8, %c0_9, %c0_10] : memref<4x32x512xbf16, #tpu.memory_space<vmem>>, vector<1x32x512xbf16>
    %13 = vector.shape_cast %12 : vector<1x32x512xbf16> to vector<32x512xbf16>
    %cst_11 = arith.constant dense<0.000000e+00> : vector<16x512xf32>
    %14 = tpu.matmul %11, %13, %cst_11 {dimension_numbers = #tpu.dot_dimension_numbers<[1], [0], [0], [1], [0, 0, 1, 1], [], []>} : vector<16x32xbf16>, vector<32x512xbf16>, vector<16x512xf32> -> vector<16x512xf32>
    %15 = arith.addf %2, %14 : vector<16x512xf32>
    %c1 = arith.constant 1 : index
    %c0_12 = arith.constant 0 : index
    %c0_13 = arith.constant 0 : index
    %16 = vector.load %arg2[%c1, %c0_12, %c0_13] : memref<4x32x32xbf16, #tpu.memory_space<vmem>>, vector<1x32x32xbf16>
    %17 = vector.shape_cast %16 : vector<1x32x32xbf16> to vector<32x32xbf16>
    %cst_14 = arith.constant dense<0.000000e+00> : vector<16x32xf32>
    %18 = tpu.matmul %11, %17, %cst_14 {dimension_numbers = #tpu.dot_dimension_numbers<[1], [0], [0], [1], [0, 0, 1, 1], [], []>} : vector<16x32xbf16>, vector<32x32xbf16>, vector<16x32xf32> -> vector<16x32xf32>
    %c1_15 = arith.constant 1 : index
    %c0_16 = arith.constant 0 : index
    %c0_17 = arith.constant 0 : index
    %19 = vector.load %arg3[%c1_15, %c0_16, %c0_17] : memref<4x1x32xf32, #tpu.memory_space<vmem>>, vector<1x1x32xf32>
    %20 = vector.shape_cast %19 : vector<1x1x32xf32> to vector<1x32xf32>
    %21 = vector.broadcast %20 : vector<1x32xf32> to vector<16x32xf32>
    %22 = arith.addf %18, %21 : vector<16x32xf32>
    %23 = math.tanh %22 : vector<16x32xf32>
    %24 = arith.truncf %23 : vector<16x32xf32> to vector<16x32xbf16>
    %c1_18 = arith.constant 1 : index
    %c0_19 = arith.constant 0 : index
    %c0_20 = arith.constant 0 : index
    %25 = vector.load %arg4[%c1_18, %c0_19, %c0_20] : memref<4x32x512xbf16, #tpu.memory_space<vmem>>, vector<1x32x512xbf16>
    %26 = vector.shape_cast %25 : vector<1x32x512xbf16> to vector<32x512xbf16>
    %cst_21 = arith.constant dense<0.000000e+00> : vector<16x512xf32>
    %27 = tpu.matmul %24, %26, %cst_21 {dimension_numbers = #tpu.dot_dimension_numbers<[1], [0], [0], [1], [0, 0, 1, 1], [], []>} : vector<16x32xbf16>, vector<32x512xbf16>, vector<16x512xf32> -> vector<16x512xf32>
    %28 = arith.addf %15, %27 : vector<16x512xf32>
    %c2 = arith.constant 2 : index
    %c0_22 = arith.constant 0 : index
    %c0_23 = arith.constant 0 : index
    %29 = vector.load %arg2[%c2, %c0_22, %c0_23] : memref<4x32x32xbf16, #tpu.memory_space<vmem>>, vector<1x32x32xbf16>
    %30 = vector.shape_cast %29 : vector<1x32x32xbf16> to vector<32x32xbf16>
    %cst_24 = arith.constant dense<0.000000e+00> : vector<16x32xf32>
    %31 = tpu.matmul %24, %30, %cst_24 {dimension_numbers = #tpu.dot_dimension_numbers<[1], [0], [0], [1], [0, 0, 1, 1], [], []>} : vector<16x32xbf16>, vector<32x32xbf16>, vector<16x32xf32> -> vector<16x32xf32>
    %c2_25 = arith.constant 2 : index
    %c0_26 = arith.constant 0 : index
    %c0_27 = arith.constant 0 : index
    %32 = vector.load %arg3[%c2_25, %c0_26, %c0_27] : memref<4x1x32xf32, #tpu.memory_space<vmem>>, vector<1x1x32xf32>
    %33 = vector.shape_cast %32 : vector<1x1x32xf32> to vector<1x32xf32>
    %34 = vector.broadcast %33 : vector<1x32xf32> to vector<16x32xf32>
    %35 = arith.addf %31, %34 : vector<16x32xf32>
    %36 = math.tanh %35 : vector<16x32xf32>
    %37 = arith.truncf %36 : vector<16x32xf32> to vector<16x32xbf16>
    %c2_28 = arith.constant 2 : index
    %c0_29 = arith.constant 0 : index
    %c0_30 = arith.constant 0 : index
    %38 = vector.load %arg4[%c2_28, %c0_29, %c0_30] : memref<4x32x512xbf16, #tpu.memory_space<vmem>>, vector<1x32x512xbf16>
    %39 = vector.shape_cast %38 : vector<1x32x512xbf16> to vector<32x512xbf16>
    %cst_31 = arith.constant dense<0.000000e+00> : vector<16x512xf32>
    %40 = tpu.matmul %37, %39, %cst_31 {dimension_numbers = #tpu.dot_dimension_numbers<[1], [0], [0], [1], [0, 0, 1, 1], [], []>} : vector<16x32xbf16>, vector<32x512xbf16>, vector<16x512xf32> -> vector<16x512xf32>
    %41 = arith.addf %28, %40 : vector<16x512xf32>
    %c3 = arith.constant 3 : index
    %c0_32 = arith.constant 0 : index
    %c0_33 = arith.constant 0 : index
    %42 = vector.load %arg2[%c3, %c0_32, %c0_33] : memref<4x32x32xbf16, #tpu.memory_space<vmem>>, vector<1x32x32xbf16>
    %43 = vector.shape_cast %42 : vector<1x32x32xbf16> to vector<32x32xbf16>
    %cst_34 = arith.constant dense<0.000000e+00> : vector<16x32xf32>
    %44 = tpu.matmul %37, %43, %cst_34 {dimension_numbers = #tpu.dot_dimension_numbers<[1], [0], [0], [1], [0, 0, 1, 1], [], []>} : vector<16x32xbf16>, vector<32x32xbf16>, vector<16x32xf32> -> vector<16x32xf32>
    %c3_35 = arith.constant 3 : index
    %c0_36 = arith.constant 0 : index
    %c0_37 = arith.constant 0 : index
    %45 = vector.load %arg3[%c3_35, %c0_36, %c0_37] : memref<4x1x32xf32, #tpu.memory_space<vmem>>, vector<1x1x32xf32>
    %46 = vector.shape_cast %45 : vector<1x1x32xf32> to vector<1x32xf32>
    %47 = vector.broadcast %46 : vector<1x32xf32> to vector<16x32xf32>
    %48 = arith.addf %44, %47 : vector<16x32xf32>
    %49 = math.tanh %48 : vector<16x32xf32>
    %50 = arith.truncf %49 : vector<16x32xf32> to vector<16x32xbf16>
    %c3_38 = arith.constant 3 : index
    %c0_39 = arith.constant 0 : index
    %c0_40 = arith.constant 0 : index
    %51 = vector.load %arg4[%c3_38, %c0_39, %c0_40] : memref<4x32x512xbf16, #tpu.memory_space<vmem>>, vector<1x32x512xbf16>
    %52 = vector.shape_cast %51 : vector<1x32x512xbf16> to vector<32x512xbf16>
    %cst_41 = arith.constant dense<0.000000e+00> : vector<16x512xf32>
    %53 = tpu.matmul %50, %52, %cst_41 {dimension_numbers = #tpu.dot_dimension_numbers<[1], [0], [0], [1], [0, 0, 1, 1], [], []>} : vector<16x32xbf16>, vector<32x512xbf16>, vector<16x512xf32> -> vector<16x512xf32>
    %54 = arith.addf %41, %53 : vector<16x512xf32>
    %c0_42 = arith.constant 0 : index
    %c0_43 = arith.constant 0 : index
    %55 = vector.load %arg5[%c0_42, %c0_43] : memref<1x512xf32, #tpu.memory_space<vmem>>, vector<1x512xf32>
    %56 = vector.broadcast %55 : vector<1x512xf32> to vector<16x512xf32>
    %57 = arith.addf %54, %56 : vector<16x512xf32>
    %58 = vector.extract_strided_slice %57 {offsets = [0, 0], sizes = [16, 128], strides = [1, 1]} : vector<16x512xf32> to vector<16x128xf32>
    %cst_44 = arith.constant dense<0xFF800000> : vector<16xf32>
    %59 = vector.multi_reduction <maximumf>, %58, %cst_44 [1] : vector<16x128xf32> to vector<16xf32>
    %60 = vector.shape_cast %59 : vector<16xf32> to vector<16x1xf32>
    %61 = vector.broadcast %60 : vector<16x1xf32> to vector<16x128xf32>
    %62 = arith.subf %58, %61 : vector<16x128xf32>
    %63 = math.exp %62 : vector<16x128xf32>
    %cst_45 = arith.constant dense<0.000000e+00> : vector<16xf32>
    %64 = vector.multi_reduction <add>, %63, %cst_45 [1] : vector<16x128xf32> to vector<16xf32>
    %65 = vector.shape_cast %64 : vector<16xf32> to vector<16x1xf32>
    %66 = math.log %65 : vector<16x1xf32>
    %67 = vector.broadcast %66 : vector<16x1xf32> to vector<16x128xf32>
    %68 = arith.subf %62, %67 : vector<16x128xf32>
    %69 = vector.extract_strided_slice %57 {offsets = [0, 128], sizes = [16, 128], strides = [1, 1]} : vector<16x512xf32> to vector<16x128xf32>
    %cst_46 = arith.constant dense<0xFF800000> : vector<16xf32>
    %70 = vector.multi_reduction <maximumf>, %69, %cst_46 [1] : vector<16x128xf32> to vector<16xf32>
    %71 = vector.shape_cast %70 : vector<16xf32> to vector<16x1xf32>
    %72 = vector.broadcast %71 : vector<16x1xf32> to vector<16x128xf32>
    %73 = arith.subf %69, %72 : vector<16x128xf32>
    %74 = math.exp %73 : vector<16x128xf32>
    %cst_47 = arith.constant dense<0.000000e+00> : vector<16xf32>
    %75 = vector.multi_reduction <add>, %74, %cst_47 [1] : vector<16x128xf32> to vector<16xf32>
    %76 = vector.shape_cast %75 : vector<16xf32> to vector<16x1xf32>
    %77 = math.log %76 : vector<16x1xf32>
    %78 = vector.broadcast %77 : vector<16x1xf32> to vector<16x128xf32>
    %79 = arith.subf %73, %78 : vector<16x128xf32>
    %80 = vector.extract_strided_slice %57 {offsets = [0, 256], sizes = [16, 128], strides = [1, 1]} : vector<16x512xf32> to vector<16x128xf32>
    %cst_48 = arith.constant dense<0xFF800000> : vector<16xf32>
    %81 = vector.multi_reduction <maximumf>, %80, %cst_48 [1] : vector<16x128xf32> to vector<16xf32>
    %82 = vector.shape_cast %81 : vector<16xf32> to vector<16x1xf32>
    %83 = vector.broadcast %82 : vector<16x1xf32> to vector<16x128xf32>
    %84 = arith.subf %80, %83 : vector<16x128xf32>
    %85 = math.exp %84 : vector<16x128xf32>
    %cst_49 = arith.constant dense<0.000000e+00> : vector<16xf32>
    %86 = vector.multi_reduction <add>, %85, %cst_49 [1] : vector<16x128xf32> to vector<16xf32>
    %87 = vector.shape_cast %86 : vector<16xf32> to vector<16x1xf32>
    %88 = math.log %87 : vector<16x1xf32>
    %89 = vector.broadcast %88 : vector<16x1xf32> to vector<16x128xf32>
    %90 = arith.subf %84, %89 : vector<16x128xf32>
    %91 = tpu.concatenate %68, %79, %90 in 1 : vector<16x128xf32>, vector<16x128xf32>, vector<16x128xf32> -> vector<16x384xf32>
    %c0_50 = arith.constant 0 : index
    %c0_51 = arith.constant 0 : index
    %92 = vector.load %arg10[%c0_50, %c0_51] : memref<16x384xf32, #tpu.memory_space<vmem>>, vector<16x384xf32>
    tpu.vector_store %arg10[%c0_50, %c0_51], %91 {strides = array<i32>} : memref<16x384xf32, #tpu.memory_space<vmem>>, vector<16x384xf32>,
    %93 = vector.extract_strided_slice %57 {offsets = [0, 384], sizes = [16, 64], strides = [1, 1]} : vector<16x512xf32> to vector<16x64xf32>
    %cst_52 = arith.constant 0.000000e+00 : f32
    %94 = vector.broadcast %cst_52 : f32 to vector<16x64xf32>
    %95 = arith.cmpf ogt, %93, %94 : vector<16x64xf32>
    %cst_53 = arith.constant 1.000000e-01 : f32
    %96 = vector.broadcast %cst_53 : f32 to vector<16x64xf32>
    %97 = arith.mulf %96, %93 : vector<16x64xf32>
    %98 = arith.select %95, %93, %97 : vector<16x64xi1>, vector<16x64xf32>
    %99 = vector.extract_strided_slice %98 {offsets = [0, 0], sizes = [16, 16], strides = [1, 1]} : vector<16x64xf32> to vector<16x16xf32>
    %100 = vector.extract_strided_slice %98 {offsets = [0, 16], sizes = [16, 16], strides = [1, 1]} : vector<16x64xf32> to vector<16x16xf32>
    %101 = vector.extract_strided_slice %98 {offsets = [0, 32], sizes = [16, 16], strides = [1, 1]} : vector<16x64xf32> to vector<16x16xf32>
    %102 = vector.extract_strided_slice %98 {offsets = [0, 48], sizes = [16, 16], strides = [1, 1]} : vector<16x64xf32> to vector<16x16xf32>
    %103 = arith.truncf %100 : vector<16x16xf32> to vector<16x16xbf16>
    %c0_54 = arith.constant 0 : index
    %c0_55 = arith.constant 0 : index
    %104 = vector.load %arg6[%c0_54, %c0_55] : memref<16x16xbf16, #tpu.memory_space<vmem>>, vector<16x16xbf16>
    %cst_56 = arith.constant dense<0.000000e+00> : vector<16x16xf32>
    %105 = tpu.matmul %103, %104, %cst_56 {dimension_numbers = #tpu.dot_dimension_numbers<[1], [0], [0], [1], [0, 0, 1, 1], [], []>} : vector<16x16xbf16>, vector<16x16xbf16>, vector<16x16xf32> -> vector<16x16xf32>
    %c0_57 = arith.constant 0 : index
    %c0_58 = arith.constant 0 : index
    %106 = vector.load %arg7[%c0_57, %c0_58] : memref<1x16xf32, #tpu.memory_space<vmem>>, vector<1x16xf32>
    %107 = vector.broadcast %106 : vector<1x16xf32> to vector<16x16xf32>
    %108 = arith.addf %105, %107 : vector<16x16xf32>
    %109 = arith.truncf %101 : vector<16x16xf32> to vector<16x16xbf16>
    %c0_59 = arith.constant 0 : index
    %c0_60 = arith.constant 0 : index
    %110 = vector.load %arg8[%c0_59, %c0_60] : memref<16x96xbf16, #tpu.memory_space<vmem>>, vector<16x96xbf16>
    %cst_61 = arith.constant dense<0.000000e+00> : vector<16x96xf32>
    %111 = tpu.matmul %109, %110, %cst_61 {dimension_numbers = #tpu.dot_dimension_numbers<[1], [0], [0], [1], [0, 0, 1, 1], [], []>} : vector<16x16xbf16>, vector<16x96xbf16>, vector<16x96xf32> -> vector<16x96xf32>
    %c0_62 = arith.constant 0 : index
    %c0_63 = arith.constant 0 : index
    %112 = vector.load %arg9[%c0_62, %c0_63] : memref<1x96xf32, #tpu.memory_space<vmem>>, vector<1x96xf32>
    %113 = vector.broadcast %112 : vector<1x96xf32> to vector<16x96xf32>
    %114 = arith.addf %111, %113 : vector<16x96xf32>
    %cst_64 = arith.constant 0.000000e+00 : f32
    %115 = vector.broadcast %cst_64 : f32 to vector<16x112xf32>
    %116 = tpu.concatenate %99, %108, %102, %114, %115 in 1 : vector<16x16xf32>, vector<16x16xf32>, vector<16x16xf32>, vector<16x96xf32>, vector<16x112xf32> -> vector<16x256xf32>
    %117 = arith.truncf %116 : vector<16x256xf32> to vector<16x256xbf16>
    %c0_65 = arith.constant 0 : index
    %c0_66 = arith.constant 0 : index
    %118 = vector.load %arg11[%c0_65, %c0_66] : memref<16x256xbf16, #tpu.memory_space<vmem>>, vector<16x256xbf16>
    tpu.vector_store %arg11[%c0_65, %c0_66], %117 {strides = array<i32>} : memref<16x256xbf16, #tpu.memory_space<vmem>>, vector<16x256xbf16>,
    return
  }
  func.func @transform_0(%arg0: i32) -> (i32, i32) {
    %c0_i32 = arith.constant 0 : i32
    %c0_i32_0 = arith.constant 0 : i32
    return %arg0, %c0_i32 : i32, i32
  }
  func.func @transform_1(%arg0: i32) -> (i32, i32, i32) {
    %c0_i32 = arith.constant 0 : i32
    %c0_i32_0 = arith.constant 0 : i32
    %c0_i32_1 = arith.constant 0 : i32
    %c0_i32_2 = arith.constant 0 : i32
    return %c0_i32, %c0_i32_0, %c0_i32_1 : i32, i32, i32
  }
  func.func @transform_2(%arg0: i32) -> (i32, i32, i32) {
    %c0_i32 = arith.constant 0 : i32
    %c0_i32_0 = arith.constant 0 : i32
    %c0_i32_1 = arith.constant 0 : i32
    %c0_i32_2 = arith.constant 0 : i32
    return %c0_i32, %c0_i32_0, %c0_i32_1 : i32, i32, i32
  }
  func.func @transform_3(%arg0: i32) -> (i32, i32, i32) {
    %c0_i32 = arith.constant 0 : i32
    %c0_i32_0 = arith.constant 0 : i32
    %c0_i32_1 = arith.constant 0 : i32
    %c0_i32_2 = arith.constant 0 : i32
    return %c0_i32, %c0_i32_0, %c0_i32_1 : i32, i32, i32
  }
  func.func @transform_4(%arg0: i32) -> (i32, i32) {
    %c0_i32 = arith.constant 0 : i32
    %c0_i32_0 = arith.constant 0 : i32
    %c0_i32_1 = arith.constant 0 : i32
    return %c0_i32, %c0_i32_0 : i32, i32
  }
  func.func @transform_5(%arg0: i32) -> (i32, i32) {
    %c0_i32 = arith.constant 0 : i32
    %c0_i32_0 = arith.constant 0 : i32
    %c0_i32_1 = arith.constant 0 : i32
    return %c0_i32, %c0_i32_0 : i32, i32
  }
  func.func @transform_6(%arg0: i32) -> (i32, i32) {
    %c0_i32 = arith.constant 0 : i32
    %c0_i32_0 = arith.constant 0 : i32
    %c0_i32_1 = arith.constant 0 : i32
    return %c0_i32, %c0_i32_0 : i32, i32
  }
  func.func @transform_7(%arg0: i32) -> (i32, i32) {
    %c0_i32 = arith.constant 0 : i32
    %c0_i32_0 = arith.constant 0 : i32
    %c0_i32_1 = arith.constant 0 : i32
    return %c0_i32, %c0_i32_0 : i32, i32
  }
  func.func @transform_8(%arg0: i32) -> (i32, i32) {
    %c0_i32 = arith.constant 0 : i32
    %c0_i32_0 = arith.constant 0 : i32
    %c0_i32_1 = arith.constant 0 : i32
    return %c0_i32, %c0_i32_0 : i32, i32
  }
  func.func @transform_9(%arg0: i32) -> (i32, i32) {
    %c0_i32 = arith.constant 0 : i32
    %c0_i32_0 = arith.constant 0 : i32
    return %arg0, %c0_i32 : i32, i32
  }
  func.func @transform_10(%arg0: i32) -> (i32, i32) {
    %c0_i32 = arith.constant 0 : i32
    %c0_i32_0 = arith.constant 0 : i32
    return %arg0, %c0_i32 : i32, i32
  }
}

</mosaic_0001>

<bundles_post_ra>
// kernel: ud_model_forward.3
= control target key start
LH: loop header
LB: loop body
LE: loop exit
PB: predicated region body
PF: predicated region fallthrough
CT: control target
= control target key end

     0   :  { %12 = vsyncpa [#allocation3], 0  ;;  %s926_s0 = inlined_call_operand.vmem [shape: bf16[2,8,16], index: 0, kind: input, shape index: {}]   ;;  %s927_s1 = inlined_call_operand.vmem [shape: bf16[2,8,16], index: 1, kind: input, shape index: {}]   ;;  %s928_s2 = inlined_call_operand.vmem [shape: bf16[2,8,16], index: 2, kind: input, shape index: {}]   ;;  %s929_s3 = inlined_call_operand.vmem [shape: bf16[2,48,16], index: 3, kind: input, shape index: {}]   ;;  %s930_s4 = inlined_call_operand.vmem [shape: f32[2,1,8], index: 4, kind: input, shape index: {}]   ;;  %s931_s5 = inlined_call_operand.hbm [shape: f32[2,8,8], index: 5, kind: output, shape index: {0}]   ;;  %s932_s6 = inlined_call_operand.vmem [shape: f32[2,8,48], index: 6, kind: output, shape index: {1}]  }
   0x1   :  { %14 = vsyncpa [#allocation3 + $0x1], 0  ;;  %s800_s21 = smov 0   ;;  %s802_s22 = smov 0  }
   0x2   :  { %s804_s23 = smov 0   ;;  %s806_s24 = smov 0  }
   0x3 LB: > { %s821_s25 = sadd.s32 4294967295, %s759_s24   ;;  %s612_s26 = sadd.s32 4294967294, %s759_s24   ;;  %s759_s24 = sphi %s806_s24, %s938_s24   ;;  %s755_s23 = sphi %s804_s23, %s937_s23   ;;  %s751_s22 = sphi %s802_s22, %s936_s22   ;;  %s747_s21 = sphi %s800_s21, %s935_s21  }
   0x4   : > { %s825_s27 = sadd.s32 1, %s759_s24   ;;  %s157_s28 = sadd.s32 1, %s755_s23 }
   0x5   : > { %s154_s29 = ssub.s32 %s759_s24, %s825_s27  ;;  %p167_p0 = scmp.ne.s32.totalorder %s755_s23, %s751_s22 }
   0x6   : > { %p155_p1 = scmp.eq.s32.totalorder %s154_s29, 0  ;;  %p168_p2 = scmp.eq.s32.totalorder %s821_s25, 1 }
   0x7   : > { %p173_p3 = scmp.ne.s32.totalorder %s751_s22, %s747_s21  ;;  %p174_p4 = scmp.eq.s32.totalorder %s612_s26, 1 }
   0x8   : > { %s836_s30 = scalar_select %p155_p1, %s755_s23, %s157_s28  }
   0x9   : > { %p838_p5 = por %p168_p2, %p167_p0  ;;  %p842_p6 = por %p174_p4, %p173_p3 }
   0xa   : > { %p615_p7 = scmp.ge.s32.totalorder %s759_s24, 1  ;;  %p253_p8 = scmp.lt.s32.totalorder %s759_s24, 3 }
   0xc   : > { %p254_p9 = pnand %p615_p7, %p253_p8 }
   0xd   : > { %p302_p10 = scmp.lt.s32.totalorder (!%p254_p9), %s821_s25, 1  ;;  %s628_s16 = sshll.u32 (!%p254_p9), %s821_s25, 7 }
   0xe   : > { %257 = sbr.rel (%p254_p9) target bundleno = 248 (0xf8), region = 40  ;;  %s764_s28 = smov (!%p254_p9), [#allocation2]  }
  0x13   : > { %v761_v0 = vmov 0.0   ;;  %s850_s9 = scalar_select %p302_p10, %s821_s25, 1  ;;  %vm762_vm0 = vmmov 0   ;;  %vm329_vm1 = vcmask 130048   ;;  %v379_v11 = vlaneseq }
  0x14   : > { %643 = vmatprep.subr.bf16.mxu1 %v761_v0  ;;  %637 = vmatprep.subr.bf16.mxu0 %v761_v0  ;;  %v763_v15 = vmov 0   ;;  %vm385_vm4 = vcmask 64512  }
  0x15   : > { %639 = vmatprep.mubr.msk.bf16.mxu0 %vm762_vm0, %v761_v0  ;;  %649 = vmatprep.mubr.msk.bf16.mxu1 %vm762_vm0, %v761_v0  ;;  %s653_s10 = smul.u32 24, %s850_s9  ;;  %s617_s11 = sshll.u32 %s850_s9, 2  ;;  %v380_v13 = vshrl.u32 %v379_v11, 7 }
  0x16   : > { %s305_s14 = scalar_lea.vmem %s926_s0, %s617_s11  ;;  %s309_s20 = scalar_lea.vmem %s927_s1, %s617_s11 }
  0x17   : > { %s318_s17 = scalar_lea.vmem %s929_s3, %s653_s10  ;;  %v328_v1 = vld [vmem:[%s305_s14] sm:$0xf]  ;;  %s313_s29 = scalar_lea.vmem %s928_s2, %s617_s11  ;;  %v381_v14 = vsub.s32 0, %v380_v13 }
  0x18   : > { %v696_v2 = vld [vmem:[%s318_s17 + $0x10] sm:$0xff]   ;;  %v334_v3 = vsel %vm329_vm1, %v328_v1, 0  ;;  %v697_v5 = vld [vmem:[%s318_s17 + $0x8] sm:$0xff]   ;;  %v327_v6 = vld [vmem:[%s309_s20] sm:$0xf]  ;;  %s321_s13 = scalar_lea.vmem %s930_s4, %s850_s9  ;;  %s293_s14 = sand.u32 1, %s751_s22  }
  0x19   : > { %638 = vmatpush3.bf16.xpose.msra.mxu0 %v334_v3  ;;  %v419_v4 = vsel %vm329_vm1, %v696_v2, 0  ;;  %v416_v7 = vsel %vm329_vm1, %v697_v5, 0  ;;  %v698_v8 = vld [vmem:[%s318_s17] sm:$0xff]   ;;  %s616_s15 = sshll.u32 %s293_s14, 3  ;;  %s881_s20 = scalar_lea.hbm %s931_s5, %s628_s16 }
  0x1a   : > { %644 = vmatpush3.bf16.xpose.msra.mxu1 %v419_v4  ;;  %v413_v9 = vsel %vm329_vm1, %v698_v8, 0  ;;  %v387_v10 = vld [vmem:[%s313_s29] sm:$0xf]  ;;  %s295_s11 = scalar_lea.vmem [#allocation2], %s616_s15  ;;  %s464_s26 = scalar_lea.sflag [#allocation3], %s293_s14 }
  0x1b   : > { %645 = vmatprep.subr.bf16.mxu1 %v761_v0  ;;  %v376_v12 = vld [vmem:[%s321_s13] sm:$0x1]  ;;  %s481_s17 = sshll.u32 %s295_s11, 4  ;;  %s703_s29 = sshll.u32 %s764_s28, 4  ;;  %s883_s17 = int_to_ptr.vmem [resolvable:$true] %s481_s17  ;;  %s704_s29 = int_to_ptr.vmem [resolvable:$false] %s703_s29 }
  0x1c   : > { %vm377_vm2 = vcmp.gt.f32.partialorder %v376_v12, 0.5  ;;  %s699_s25 = scalar_lea.vmem %s883_s17, 128  ;;  %s705_s10 = scalar_lea.vmem %s704_s29, 256 }
  0x1d   : > { %v378_v16 = vsel %vm377_vm2, 1, %v763_v15  ;;  %p700_p11 = scmp.ne.s32.totalorder %s883_s17, %s699_s25  ;;  %p706_p0 = scmp.lt.s32.totalorder %s883_s17, %s704_s29 }
  0x1e   : > { %v382_v17 = vrot.slane %v378_v16, %v381_v14  ;;  %p707_p1 = scmp.lt.s32.totalorder %s705_s10, %s699_s25 }
  0x1f   : > { %p701_p12 = pnand %p700_p11, %p838_p5 }
  0x20   : > { %640 = vmatmul.mubr.msk.bf16.vlgmr.msra.gmra.mxu0 %vm329_vm1, %v327_v6  ;;  %vm383_vm3 = vcmp.eq.s32.totalorder %v382_v17, 1  ;;  %p708_p2 = por %p707_p1, %p706_p0 }
  0x21   : > { %p702_p13 = pneg %p701_p12 }
  0x22   : > { %646 = vmatpush3.bf16.xpose.msra.mxu1 %v416_v7 }
  0x23   : > { %647 = vmatprep.subr.bf16.mxu1 %v761_v0  ;;  %p709_p3 = pnand %p708_p2, %p702_p13 }
  0x2a   : > { %648 = vmatpush3.bf16.xpose.msra.mxu1 %v413_v9 }
  0x31   : > { %650 = vmatmul.mubr.msk.bf16.vlgmr.msra.gmra.mxu1 %vm329_vm1, %v387_v10 }
  0xe0   : > { %v370_v18 = vpop.f32.mrf.mxu0 }
  0xe1   : > { %v384_v19 = vsel %vm383_vm3, %v370_v18, -inf }
  0xe2   : > { %386 = vst.msk [vmem:[%s295_s11] sm:$0xff] %vm385_vm4, %v384_v19  ;;  %v641_v20 = vpop.f32.mrf.mxu0 }
  0xe3   : > { %712 = shalt.err (!%p709_p3)
}
  0xe4   : > { %s713_s12 = scalar_lea.hbm %s881_s20, 128  ;;  %s717_s15 = scalar_lea.hbm %s931_s5, 256 }
  0xe5   : > { %p714_p4 = scmp.ne.s32.totalorder %s881_s20, %s713_s12  ;;  %p718_p9 = scmp.lt.s32.totalorder %s881_s20, %s931_s5 }
  0xe6   : > { %p719_p10 = scmp.lt.s32.totalorder %s717_s15, %s713_s12 }
  0xe7   : > { %p715_p7 = pnand %p714_p4, %p838_p5 }
  0xe8   : > { %p720_p11 = por %p719_p10, %p718_p9 }
  0xe9   : > { %p716_p8 = pneg %p715_p7 }
  0xeb   : > { %p721_p12 = pnand %p720_p11, %p716_p8 }
  0xed   : > { %724 = shalt.err (!%p721_p12)
}
  0xee   : > { %654 = dma.vmem_to_hbm [thread:$0]  (%p838_p5), %s883_s17, 128, %s881_s20, %s464_s26   ;;  %v373_v21 = vpop.f32.mrf.mxu0  ;;  %vm461_vm5 = vcmask 392192  }
  0xef   : > { %s621_s18 = sshll.u32 %s850_s9, 3 }
  0xf0   : > { %v642_v22 = vpop.f32.mrf.mxu0  ;;  %s325_s28 = scalar_lea.vmem %s932_s6, %s621_s18 }
  0xf1   : > { %v455_v23 = vpop.f32.mrf.mxu1 }
  0xf2   : > { %462 = vst.msk [vmem:[%s325_s28] sm:$0xff] %vm461_vm5, %v455_v23 }
  0xf3   : > { %v651_v24 = vpop.f32.mrf.mxu1 }
  0xf5   : > { %v458_v25 = vpop.f32.mrf.mxu1 }
  0xf7   : > { %v652_v26 = vpop.f32.mrf.mxu1 }
  0xf8 PF: > { %p660_p13 = scmp.ge.s32.totalorder %s759_s24, 2  ;;  %s496_s7 = sand.u32 1, %s747_s21  }
  0xf9   : > { %s497_s9 = scalar_lea.sflag [#allocation3], %s496_s7 }
  0xfa   : > { %p657_p5 = pnand %p660_p13, %p842_p6 }
  0xfc   : > { %p658_p0 = pneg %p657_p5 }
  0xfe   : > { %742 = dma.done.wait (%p658_p0), %s497_s9, 128  }
  0xff   : > { %744 = vsyncadd (%p658_p0), %s497_s9, 4294967168  ;;  %p17_p1 = scmp.ge.s32.totalorder %s825_s27, 4   ;;  %s935_s21 = smov %s751_s22 }
 0x100   : > { %s936_s22 = smov %s755_s23  ;;  %s937_s23 = smov %s836_s30 }
 0x101   : > { %s938_s24 = smov %s825_s27  ;;  %19 = sbr.rel (!%p17_p1) target bundleno = 3 (0x3), region = 99 }
 0x106   :  { %509 = vsyncpa [#allocation3], 1 }
 0x107   :  { %511 = vsyncpa [#allocation3 + $0x1], 1 }

// kernel: ud_model_forward.2
= control target key start
LH: loop header
LB: loop body
LE: loop exit
PB: predicated region body
PF: predicated region fallthrough
CT: control target
= control target key end

     0   :  { %v1450_v0 = vmov 0.0   ;;  %vm1451_vm0 = vmmov 0   ;;  %vm61_vm1 = vcmask 261120   ;;  %v1452_v19 = vmov 0   ;;  %s1456_s11 = smov 48   ;;  %s1782_s1 = inlined_call_operand.vmem [shape: bf16[4,32,32], index: 1, kind: input, shape index: {}]   ;;  %s1783_s0 = inlined_call_operand.vmem [shape: f32[16,32], index: 0, kind: input, shape index: {}]   ;;  %s1784_s2 = inlined_call_operand.vmem [shape: f32[4,1,32], index: 2, kind: input, shape index: {}]   ;;  %s1785_s3 = inlined_call_operand.vmem [shape: bf16[4,32,512], index: 3, kind: input, shape index: {}]   ;;  %s1786_s5 = inlined_call_operand.vmem [shape: bf16[16,16], index: 5, kind: input, shape index: {}]   ;;  %s1787_s7 = inlined_call_operand.vmem [shape: bf16[16,96], index: 7, kind: input, shape index: {}]   ;;  %s1788_s4 = inlined_call_operand.vmem [shape: f32[1,512], index: 4, kind: input, shape index: {}]   ;;  %s1789_s9 = inlined_call_operand.vmem [shape: f32[16,384], index: 9, kind: output, shape index: {0}]   ;;  %s1790_s6 = inlined_call_operand.vmem [shape: f32[1,16], index: 6, kind: input, shape index: {}]   ;;  %s1791_s8 = inlined_call_operand.vmem [shape: f32[1,96], index: 8, kind: input, shape index: {}]   ;;  %s1792_s10 = inlined_call_operand.vmem [shape: bf16[16,256], index: 10, kind: output, shape index: {1}]  }
   0x1   :  { %1286 = vmatprep.subr.bf16.mxu0 %v1450_v0  ;;  %v1352_v1 = vld [vmem:[%s1782_s1 + $0x8] sm:$0xff]   ;;  %1290 = vmatprep.mubr.msk.bf16.mxu0 %vm1451_vm0, %v1450_v0  ;;  %v1353_v2 = vld [vmem:[%s1782_s1] sm:$0xff]   ;;  %v1354_v6 = vld [vmem:[%s1782_s1 + $0x18] sm:$0xff]   ;;  %vm1004_vm4 = vcmask 130048   ;;  %vm1138_vm5 = vcmask 392192  }
   0x2   :  { %1294 = vmatprep.subr.bf16.mxu1 %v1450_v0  ;;  %1298 = vmatprep.mubr.msk.bf16.mxu1 %vm1451_vm0, %v1450_v0  ;;  %v35_v3 = vld [vmem:[%s1783_s0] sm:$0xff]  ;;  %v36_v4 = vld [vmem:[%s1783_s0 + $0x8] sm:$0xff]  ;;  %v1355_v7 = vld [vmem:[%s1782_s1 + $0x10] sm:$0xff]  }
   0x3   :  { %1287 = vmatpush3.bf16.msra.mxu0 %v1352_v1  ;;  %v37_v5 = vpack.c.bf16 %v36_v4, %v35_v3  ;;  %1295 = vmatpush3.bf16.msra.mxu1 %v1354_v6  ;;  %v1165_v8 = vld [vmem:[%s1784_s2] ss:$0 sm:$0xff]  ;;  %v1358_v20 = vld [vmem:[%s1785_s3 + $0x64] ss:$16 sps:$4 sm:$0xff]   ;;  %v1359_v21 = vld [vmem:[%s1785_s3 + $0x68] ss:$16 sps:$4 sm:$0xff]  }
   0x4   :  { %1288 = vmatprep.subr.bf16.mxu0 %v1450_v0  ;;  %1296 = vmatprep.subr.bf16.mxu1 %v1450_v0  ;;  %v1356_v18 = vld [vmem:[%s1785_s3 + $0x60] ss:$16 sps:$4 sm:$0xff]   ;;  %v1361_v22 = vld [vmem:[%s1785_s3 + $0x6c] ss:$16 sps:$4 sm:$0xff]   ;;  %v1364_v24 = vld [vmem:[%s1785_s3 + $0x44] ss:$16 sps:$4 sm:$0xff]  }
   0x5   :  { %v1362_v23 = vld [vmem:[%s1785_s3 + $0x40] ss:$16 sps:$4 sm:$0xff]   ;;  %v1365_v25 = vld [vmem:[%s1785_s3 + $0x48] ss:$16 sps:$4 sm:$0xff]   ;;  %v1367_v26 = vld [vmem:[%s1785_s3 + $0x4c] ss:$16 sps:$4 sm:$0xff]  }
   0x6   :  { %v1370_v27 = vld [vmem:[%s1785_s3 + $0x24] ss:$16 sps:$4 sm:$0xff]   ;;  %v1373_v28 = vld [vmem:[%s1785_s3 + $0x2c] ss:$16 sps:$4 sm:$0xff]   ;;  %v1174_v29 = vld [vmem:[%s1784_s2 + $0x1] ss:$0 sm:$0xff] }
   0x7   :  { %1289 = vmatpush3.bf16.msra.mxu0 %v1353_v2  ;;  %1297 = vmatpush3.bf16.msra.mxu1 %v1355_v7  ;;  %v1368_v38 = vld [vmem:[%s1785_s3 + $0x20] ss:$16 sps:$4 sm:$0xff]   ;;  %v1371_v39 = vld [vmem:[%s1785_s3 + $0x28] ss:$16 sps:$4 sm:$0xff]   ;;  %v1376_v41 = vld [vmem:[%s1785_s3 + $0x4] ss:$16 sps:$4 sm:$0xff]  }
   0x8   :  { %253 = vmatprep.subr.bf16.mxu0 %v1358_v20  ;;  %296 = vmatprep.subr.bf16.mxu1 %v1361_v22  ;;  %v1379_v42 = vld [vmem:[%s1785_s3 + $0xc] ss:$16 sps:$4 sm:$0xff]   ;;  %v1374_v43 = vld [vmem:[%s1785_s3] ss:$16 sps:$4 sm:$0xff]   ;;  %v1377_v44 = vld [vmem:[%s1785_s3 + $0x8] ss:$16 sps:$4 sm:$0xff]  }
   0x9   :  { %v1380_v45 = vld [vmem:[%s1782_s1 + $0x28] sm:$0xff]   ;;  %v1381_v46 = vld [vmem:[%s1782_s1 + $0x20] sm:$0xff]  }
   0xa   :  { %1291 = vmatmul.mubr.msk.bf16.vlgmr.msra.gmra.mxu0 %vm61_vm1, %v37_v5  ;;  %v1382_v47 = vld [vmem:[%s1785_s3 + $0xa0] ss:$16 sps:$4 sm:$0xff]   ;;  %v1384_v48 = vld [vmem:[%s1785_s3 + $0xa4] ss:$16 sps:$4 sm:$0xff]   ;;  %v1385_v49 = vld [vmem:[%s1785_s3 + $0xa8] ss:$16 sps:$4 sm:$0xff]  }
   0xb   :  { %273 = vmatprep.mubr.bf16.mxu0 %v1452_v19  ;;  %254 = vmatpush1.bf16.msra.mxu0 %v1356_v18  ;;  %v1387_v50 = vld [vmem:[%s1785_s3 + $0xac] ss:$16 sps:$4 sm:$0xff]   ;;  %v1390_v51 = vld [vmem:[%s1785_s3 + $0x84] ss:$16 sps:$4 sm:$0xff]   ;;  %v1388_v53 = vld [vmem:[%s1785_s3 + $0x80] ss:$16 sps:$4 sm:$0xff]  }
   0xc   :  { %255 = vmatprep.subr.bf16.mxu0 %v1364_v24  ;;  %v1393_v52 = vld [vmem:[%s1785_s3 + $0x8c] ss:$16 sps:$4 sm:$0xff]   ;;  %v1391_v54 = vld [vmem:[%s1785_s3 + $0x88] ss:$16 sps:$4 sm:$0xff]  }
   0xd   :  { %v1394_v24 = vld [vmem:[%s1782_s1 + $0x38] sm:$0xff]  }
   0xf   :  { %256 = vmatpush1.bf16.msra.mxu0 %v1362_v23 }
  0x10   :  { %379 = vmatprep.subr.bf16.mxu0 %v1370_v27  ;;  %v1396_v27 = vld [vmem:[%s1785_s3 + $0xe8] ss:$16 sps:$4 sm:$0xff]  }
  0xca   :  { %v99_v9 = vpop.f32.mrf.mxu0 }
  0xcb   :  { %v100_v10 = vadd.f32 %v1165_v8, %v99_v9 }
  0xcc   :  { %v1292_v11 = vpop.f32.mrf.mxu0 }
  0xcd   :  { %1410 = vtanh.f32 %v100_v10 }
  0xce   :  { %v102_v12 = vpop.f32.mrf.mxu0 }
  0xcf   :  { %v103_v13 = vadd.f32 %v1165_v8, %v102_v12 }
  0xd0   :  { %v1293_v14 = vpop.f32.mrf.mxu0 }
  0xd1   :  { %1412 = vtanh.f32 %v103_v13  ;;  %v1211_v14 = vld [vmem:[%s1784_s2 + $0x2] ss:$0 sm:$0xff] }
  0xda   :  { %v1411_v15 = vpop.eup %1410 }
  0xde   :  { %v1413_v16 = vpop.eup %1412 }
  0xdf   :  { %v108_v17 = vpack.c.bf16 %v1413_v16, %v1411_v15 }
  0xe1   :  { %1299 = vmatmul.mubr.msk.bf16.vlgmr.msra.gmra.mxu1 %vm61_vm1, %v108_v17 }
  0xe2   :  { %316 = vmatprep.mubr.bf16.mxu1 %v1452_v19  ;;  %297 = vmatpush1.bf16.msra.mxu1 %v1359_v21 }
  0xe3   :  { %298 = vmatprep.subr.bf16.mxu1 %v1367_v26  ;;  %v1395_v26 = vld [vmem:[%s1782_s1 + $0x30] sm:$0xff]  }
  0xe6   :  { %299 = vmatpush1.bf16.msra.mxu1 %v1365_v25 }
  0xe7   :  { %422 = vmatprep.subr.bf16.mxu1 %v1373_v28  ;;  %v1398_v28 = vld [vmem:[%s1785_s3 + $0xec] ss:$16 sps:$4 sm:$0xff]  }
 0x1a1   :  { %v179_v30 = vpop.f32.mrf.mxu1 }
 0x1a2   :  { %v180_v31 = vadd.f32 %v1174_v29, %v179_v30  ;;  %v1401_v30 = vld [vmem:[%s1785_s3 + $0xe4] ss:$16 sps:$4 sm:$0xff]  }
 0x1a3   :  { %v1300_v32 = vpop.f32.mrf.mxu1 }
 0x1a4   :  { %1414 = vtanh.f32 %v180_v31  ;;  %v1407_v31 = vld [vmem:[%s1785_s3 + $0xc4] ss:$16 sps:$4 sm:$0xff]   ;;  %v1402_v32 = vld [vmem:[%s1785_s3 + $0xc8] ss:$16 sps:$4 sm:$0xff]  }
 0x1a5   :  { %v182_v33 = vpop.f32.mrf.mxu1 }
 0x1a6   :  { %v183_v34 = vadd.f32 %v1174_v29, %v182_v33  ;;  %v1399_v29 = vld [vmem:[%s1785_s3 + $0xe0] ss:$16 sps:$4 sm:$0xff]  }
 0x1a7   :  { %v1301_v35 = vpop.f32.mrf.mxu1  ;;  %v1405_v33 = vld [vmem:[%s1785_s3 + $0xc0] ss:$16 sps:$4 sm:$0xff]  }
 0x1a8   :  { %1416 = vtanh.f32 %v183_v34 }
 0x1b1   :  { %v1415_v36 = vpop.eup %1414 }
 0x1b5   :  { %v1417_v37 = vpop.eup %1416 }
 0x1b6   :  { %v188_v40 = vpack.c.bf16 %v1417_v37, %v1415_v36 }
 0x1b8   :  { %1194 = vmatmul.mubr.msk.bf16.vlgmr.msra.gmra.mxu0 %vm61_vm1, %v188_v40  ;;  %1195 = vmatmul.mubr.msk.bf16.vlgmr.msra.gmra.mxu1 %vm61_vm1, %v188_v40 }
 0x1b9   :  { %380 = vmatpush1.bf16.msra.mxu0 %v1368_v38  ;;  %423 = vmatpush1.bf16.msra.mxu1 %v1371_v39 }
 0x1ba   :  { %381 = vmatprep.subr.bf16.mxu0 %v1376_v41  ;;  %424 = vmatprep.subr.bf16.mxu1 %v1379_v42 }
 0x1bb   :  { %399 = vmatprep.mubr.bf16.mxu0 %v1452_v19  ;;  %442 = vmatprep.mubr.bf16.mxu1 %v1452_v19 }
 0x1bd   :  { %382 = vmatpush1.bf16.msra.mxu0 %v1374_v43  ;;  %425 = vmatpush1.bf16.msra.mxu1 %v1377_v44  ;;  %v1238_v43 = vld [vmem:[%s1784_s2 + $0x3] ss:$0 sm:$0xff] }
 0x1be   :  { %1302 = vmatprep.subr.bf16.mxu0 %v1450_v0  ;;  %586 = vmatprep.subr.bf16.mxu1 %v1384_v48 }
 0x1c0   :  { %1204 = vmatmul.mubr.msk.bf16.vlgmr.msra.gmra.mxu0 %vm61_vm1, %v108_v17  ;;  %1205 = vmatmul.mubr.msk.bf16.vlgmr.msra.gmra.mxu1 %vm61_vm1, %v108_v17 }
 0x1c1   :  { %1303 = vmatpush3.bf16.msra.mxu0 %v1380_v45  ;;  %1306 = vmatprep.mubr.msk.bf16.mxu0 %vm1451_vm0, %v1450_v0 }
 0x1c2   :  { %1304 = vmatprep.subr.bf16.mxu0 %v1450_v0  ;;  %606 = vmatprep.mubr.bf16.mxu1 %v1452_v19 }
 0x1c3   :  { %587 = vmatpush1.bf16.msra.mxu1 %v1382_v47 }
 0x1c4   :  { %588 = vmatprep.subr.bf16.mxu1 %v1390_v51 }
 0x1c5   :  { %1305 = vmatpush3.bf16.msra.mxu0 %v1381_v46 }
 0x1c6   :  { %629 = vmatprep.subr.bf16.mxu0 %v1387_v50 }
 0x1c7   :  { %589 = vmatpush1.bf16.msra.mxu1 %v1388_v53  ;;  %v1408_v53 = vld [vmem:[%s1786_s5] sm:$0xff]   ;;  %s1454_s5 = smov 96  }
 0x1c8   :  { %1307 = vmatmul.mubr.msk.bf16.vlgmr.msra.gmra.mxu0 %vm61_vm1, %v188_v40  ;;  %1310 = vmatprep.subr.bf16.mxu1 %v1450_v0 }
 0x1c9   :  { %649 = vmatprep.mubr.bf16.mxu0 %v1452_v19  ;;  %630 = vmatpush1.bf16.msra.mxu0 %v1385_v49 }
 0x1ca   :  { %631 = vmatprep.subr.bf16.mxu0 %v1393_v52 }
 0x1cd   :  { %632 = vmatpush1.bf16.msra.mxu0 %v1391_v54  ;;  %v1409_v54 = vld [vmem:[%s1787_s7] sm:$0xff]  }
 0x1ce   :  { %801 = vmatprep.subr.bf16.mxu0 %v1401_v30 }
 0x278   :  { %v275_v55 = vpop.f32.mrf.mxu0  ;;  %v318_v56 = vpop.f32.mrf.mxu1 }
 0x27a   :  { %v277_v57 = vpop.f32.mrf.mxu0  ;;  %v320_v58 = vpop.f32.mrf.mxu1 }
 0x27c   :  { %v279_v59 = vpop.f32.mrf.mxu0  ;;  %v322_v60 = vpop.f32.mrf.mxu1 }
 0x27e   :  { %v281_v61 = vpop.f32.mrf.mxu0  ;;  %v1640_v62 = vpop.f32.mrf.mxu1 }
 0x280   :  { %v401_v63 = vpop.f32.mrf.mxu0  ;;  %v444_v1 = vpop.f32.mrf.mxu1 }
 0x281   :  { %v402_v2 = vadd.f32 %v401_v63, %v275_v55  ;;  %v1642_v3 = vadd.f32 %v444_v1, %v318_v56  ;;  %v885_v56 = vlaneseq }
 0x282   :  { %v403_v4 = vpop.f32.mrf.mxu0  ;;  %v446_v5 = vpop.f32.mrf.mxu1 }
 0x283   :  { %v404_v6 = vadd.f32 %v403_v4, %v277_v57  ;;  %v1644_v7 = vadd.f32 %v446_v5, %v320_v58  ;;  %v886_v58 = vshrl.u32 %v885_v56, 7 }
 0x284   :  { %v405_v8 = vpop.f32.mrf.mxu0  ;;  %v448_v9 = vpop.f32.mrf.mxu1 }
 0x285   :  { %v406_v10 = vadd.f32 %v405_v8, %v279_v59  ;;  %v1646_v11 = vadd.f32 %v448_v9, %v322_v60  ;;  %v887_v60 = vsub.s32 0, %v886_v58 }
 0x286   :  { %v407_v12 = vpop.f32.mrf.mxu0  ;;  %v450_v34 = vpop.f32.mrf.mxu1 }
 0x287   :  { %v408_v13 = vadd.f32 %v407_v12, %v281_v61  ;;  %v899_v61 = vsub.s32 3, %v886_v58  ;;  %v451_v12 = vadd.f32 %v450_v34, %v1640_v62 }
 0x288   :  { %v512_v15 = vpop.f32.mrf.mxu0 }
 0x289   :  { %v513_v16 = vadd.f32 %v1211_v14, %v512_v15 }
 0x28a   :  { %v1308_v17 = vpop.f32.mrf.mxu0 }
 0x28b   :  { %1418 = vtanh.f32 %v513_v16 }
 0x28c   :  { %v515_v18 = vpop.f32.mrf.mxu0 }
 0x28d   :  { %v516_v20 = vadd.f32 %v1211_v14, %v515_v18 }
 0x28e   :  { %v1309_v21 = vpop.f32.mrf.mxu0 }
 0x28f   :  { %1420 = vtanh.f32 %v516_v20  ;;  %v891_v21 = vsub.s32 1, %v886_v58 }
 0x298   :  { %v1419_v22 = vpop.eup %1418 }
 0x29c   :  { %v1421_v23 = vpop.eup %1420 }
 0x29d   :  { %v521_v25 = vpack.c.bf16 %v1421_v23, %v1419_v22 }
 0x29f   :  { %1231 = vmatmul.mubr.msk.bf16.vlgmr.msra.gmra.mxu1 %vm61_vm1, %v521_v25  ;;  %1232 = vmatmul.mubr.msk.bf16.vlgmr.msra.gmra.mxu0 %vm61_vm1, %v521_v25 }
 0x2a0   :  { %1311 = vmatpush3.bf16.msra.mxu1 %v1394_v24  ;;  %1314 = vmatprep.mubr.msk.bf16.mxu1 %vm1451_vm0, %v1450_v0  ;;  %v895_v24 = vsub.s32 2, %v886_v58 }
 0x2a1   :  { %1312 = vmatprep.subr.bf16.mxu1 %v1450_v0  ;;  %821 = vmatprep.mubr.bf16.mxu0 %v1452_v19 }
 0x2a2   :  { %802 = vmatpush1.bf16.msra.mxu0 %v1399_v29 }
 0x2a3   :  { %803 = vmatprep.subr.bf16.mxu0 %v1407_v31 }
 0x2a4   :  { %1313 = vmatpush3.bf16.msra.mxu1 %v1395_v26 }
 0x2a5   :  { %844 = vmatprep.subr.bf16.mxu1 %v1398_v28 }
 0x2a6   :  { %804 = vmatpush1.bf16.msra.mxu0 %v1405_v33 }
 0x2a7   :  { %1315 = vmatmul.mubr.msk.bf16.vlgmr.msra.gmra.mxu1 %vm61_vm1, %v521_v25  ;;  %1318 = vmatprep.subr.bf16.mxu0 %v1450_v0 }
 0x2a8   :  { %864 = vmatprep.mubr.bf16.mxu1 %v1452_v19  ;;  %v1404_v19 = vld [vmem:[%s1785_s3 + $0xcc] ss:$16 sps:$4 sm:$0xff]   ;;  %845 = vmatpush1.bf16.msra.mxu1 %v1396_v27 }
 0x2a9   :  { %846 = vmatprep.subr.bf16.mxu1 %v1404_v19 }
 0x2ac   :  { %847 = vmatpush1.bf16.msra.mxu1 %v1402_v32 }
 0x2ad   :  { %1324 = vmatprep.subr.bf16.mxu1 %v1450_v0 }
 0x35f   :  { %v608_v35 = vpop.f32.mrf.mxu1  ;;  %v651_v55 = vpop.f32.mrf.mxu0 }
 0x360   :  { %v660_v36 = vadd.f32 %v608_v35, %v402_v2  ;;  %v662_v27 = vadd.f32 %v651_v55, %v1642_v3 }
 0x361   :  { %v610_v37 = vpop.f32.mrf.mxu1  ;;  %v653_v57 = vpop.f32.mrf.mxu0 }
 0x362   :  { %v1691_v38 = vadd.f32 %v610_v37, %v404_v6  ;;  %v663_v5 = vadd.f32 %v653_v57, %v1644_v7 }
 0x363   :  { %v612_v39 = vpop.f32.mrf.mxu1  ;;  %v655_v59 = vpop.f32.mrf.mxu0 }
 0x364   :  { %v664_v40 = vadd.f32 %v612_v39, %v406_v10  ;;  %v666_v33 = vadd.f32 %v655_v59, %v1646_v11 }
 0x365   :  { %v614_v41 = vpop.f32.mrf.mxu1  ;;  %v657_v63 = vpop.f32.mrf.mxu0 }
 0x366   :  { %v665_v42 = vadd.f32 %v614_v41, %v408_v13  ;;  %v667_v17 = vadd.f32 %v657_v63, %v451_v12 }
 0x367   :  { %v727_v44 = vpop.f32.mrf.mxu1 }
 0x368   :  { %v728_v45 = vadd.f32 %v1238_v43, %v727_v44 }
 0x369   :  { %v1316_v46 = vpop.f32.mrf.mxu1 }
 0x36a   :  { %1422 = vtanh.f32 %v728_v45 }
 0x36b   :  { %v730_v47 = vpop.f32.mrf.mxu1 }
 0x36c   :  { %v731_v48 = vadd.f32 %v1238_v43, %v730_v47 }
 0x36d   :  { %v1317_v49 = vpop.f32.mrf.mxu1 }
 0x36e   :  { %1424 = vtanh.f32 %v731_v48 }
 0x377   :  { %v1423_v50 = vpop.eup %1422 }
 0x37b   :  { %v1425_v51 = vpop.eup %1424 }
 0x37c   :  { %v736_v52 = vpack.c.bf16 %v1425_v51, %v1423_v50 }
 0x37e   :  { %1258 = vmatmul.mubr.msk.bf16.vlgmr.msra.gmra.mxu0 %vm61_vm1, %v736_v52  ;;  %1259 = vmatmul.mubr.msk.bf16.vlgmr.msra.gmra.mxu1 %vm61_vm1, %v736_v52 }
 0x37f   :  { %1320 = vmatprep.mubr.msk.bf16.mxu0 %vm1451_vm0, %v1450_v0  ;;  %1326 = vmatprep.mubr.msk.bf16.mxu1 %vm1451_vm0, %v1450_v0  ;;  %v883_v0 = vld [vmem:[%s1788_s4] sm:$0xf]  ;;  %s1453_s4 = smov 112  }
 0x380   :  { %1319 = vmatpush3.bf16.msra.mxu0 %v1408_v53  ;;  %1325 = vmatpush3.bf16.msra.mxu1 %v1409_v54  ;;  %v888_v1 = vrot.slane %v883_v0, %v887_v60  ;;  %v900_v8 = vrot.slane %v883_v0, %v899_v61  ;;  %v892_v62 = vrot.slane %v883_v0, %v891_v21 }
 0x381   :  { %v896_v30 = vrot.slane %v883_v0, %v895_v24 }
 0x43e   :  { %v823_v2 = vpop.f32.mrf.mxu0  ;;  %v866_v4 = vpop.f32.mrf.mxu1 }
 0x43f   :  { %v875_v6 = vadd.f32 %v823_v2, %v660_v36  ;;  %v877_v19 = vadd.f32 %v866_v4, %v662_v27 }
 0x440   :  { %v825_v9 = vpop.f32.mrf.mxu0  ;;  %v868_v10 = vpop.f32.mrf.mxu1 }
 0x441   :  { %v878_v13 = vadd.f32 %v868_v10, %v663_v5  ;;  %v905_v14 = vadd.f32 %v888_v1, %v875_v6  ;;  %v907_v37 = vadd.f32 %v896_v30, %v877_v19  ;;  %v876_v11 = vadd.f32 %v825_v9, %v1691_v38 }
 0x442   :  { %v827_v15 = vpop.f32.mrf.mxu0  ;;  %v870_v16 = vpop.f32.mrf.mxu1 }
 0x443   :  { %v908_v18 = vadd.f32 %v900_v8, %v878_v13  ;;  %v879_v20 = vadd.f32 %v827_v15, %v664_v40  ;;  %913 = vmax.xlane.f32.xlu1 %v905_v14  ;;  %v881_v36 = vadd.f32 %v870_v16, %v666_v33  ;;  %v906_v40 = vadd.f32 %v892_v62, %v876_v11  ;;  %v1260_v16 = vld [vmem:[%s1790_s6] ss:$0 sm:$0xff]  ;;  %s1455_s6 = smov 16  }
 0x444   :  { %v829_v22 = vpop.f32.mrf.mxu0  ;;  %v872_v23 = vpop.f32.mrf.mxu1 }
 0x445   :  { %v880_v25 = vadd.f32 %v829_v22, %v665_v42  ;;  %v882_v7 = vadd.f32 %v872_v23, %v667_v17  ;;  %v909_v26 = vadd.f32 %v888_v1, %v879_v20  ;;  %v981_v28 = vmul.f32 0.1, %v908_v18 }
 0x446   :  { %vm979_vm2 = vcmp.gt.f32.partialorder %v908_v18, 0.0  ;;  %v911_v39 = vadd.f32 %v896_v30, %v881_v36 }
 0x447   :  { %v912_v29 = vadd.f32 %v900_v8, %v882_v7  ;;  %915 = vmax.xlane.f32.xlu1 %v909_v26  ;;  %v910_v32 = vadd.f32 %v892_v62, %v880_v25  ;;  %v1715_v34 = vsel %vm979_vm2, %v908_v18, %v981_v28  ;;  %v1263_v7 = vld [vmem:[%s1791_s8] ss:$0 sm:$0xff] }
 0x449   :  { %v982_v31 = vmul.f32 0.1, %v912_v29  ;;  %vm980_vm3 = vcmp.gt.f32.partialorder %v912_v29, 0.0 }
 0x44b   :  { %935 = vmax.xlane.f32.xlu1 %v910_v32  ;;  %v1717_v35 = vsel %vm980_vm3, %v912_v29, %v982_v31 }
 0x44c   :  { %v985_v3 = vpack.c.bf16 %v1717_v35, %v1715_v34  ;;  %v1342_v63 = vpack.i.bf16 %v1717_v35, %v1715_v34 }
 0x44e   :  { %996 = vrot.lane.b32.xlu0 %v985_v3, %s1453_s4 }
 0x44f   :  { %953 = vmax.xlane.f32.xlu1 %v907_v37 }
 0x452   :  { %1058 = vrot.lane.b32.xlu0 %v985_v3, %s1454_s5 }
 0x453   :  { %955 = vmax.xlane.f32.xlu1 %v911_v39 }
 0x471   :  { %933 = vmax.xlane.f32.xlu0 %v906_v40 }
 0x4c0   :  { %v997_v41 = vpop.permute.xlu0 %996 }
 0x4c1   :  { %1321 = vmatmul.mubr.msk.bf16.vlgmr.msra.gmra.mxu0 %vm1004_vm4, %v997_v41 }
 0x4c4   :  { %v1059_v42 = vpop.permute.xlu0 %1058 }
 0x4c5   :  { %1327 = vmatmul.mubr.msk.bf16.vlgmr.msra.gmra.mxu1 %vm1004_vm4, %v1059_v42 }
 0x4cc   :  { %v914_v43 = vpop.xlane.xlu1 %913 }
 0x4cd   :  { %v917_v44 = vsub.f32 %v905_v14, %v914_v43 }
 0x4cf   :  { %v919_v45 = vmul.f32 1.442695, %v917_v44 }
 0x4d0   :  { %v916_v46 = vpop.xlane.xlu1 %915 }
 0x4d1   :  { %1426 = vpow2.f32 %v919_v45  ;;  %v1728_v57 = vsub.f32 %v909_v26, %v916_v46 }
 0x4d3   :  { %v921_v60 = vmul.f32 1.442695, %v1728_v57 }
 0x4d4   :  { %v936_v47 = vpop.xlane.xlu1 %935 }
 0x4d5   :  { %v1734_v0 = vsub.f32 %v910_v32, %v936_v47 }
 0x4d7   :  { %v941_v61 = vmul.f32 1.442695, %v1734_v0 }
 0x4d8   :  { %v954_v48 = vpop.xlane.xlu1 %953 }
 0x4d9   :  { %v957_v49 = vsub.f32 %v907_v37, %v954_v48 }
 0x4db   :  { %v959_v50 = vmul.f32 1.442695, %v957_v49 }
 0x4dc   :  { %v956_v51 = vpop.xlane.xlu1 %955 }
 0x4dd   :  { %1428 = vpow2.f32 %v959_v50  ;;  %v1725_v38 = vsub.f32 %v911_v39, %v956_v51 }
 0x4de   :  { %v1427_v52 = vpop.eup %1426 }
 0x4df   :  { %v961_v53 = vmul.f32 1.442695, %v1725_v38  ;;  %923 = vadd.xlane.f32.xlu1 %v1427_v52 }
 0x4e1   :  { %1430 = vpow2.f32 %v961_v53 }
 0x4ea   :  { %v1429_v54 = vpop.eup %1428 }
 0x4eb   :  { %963 = vadd.xlane.f32.xlu1 %v1429_v54 }
 0x4ee   :  { %v1431_v55 = vpop.eup %1430 }
 0x4ef   :  { %965 = vadd.xlane.f32.xlu0 %v1431_v55 }
 0x4fa   :  { %v934_v56 = vpop.xlane.xlu0 %933 }
 0x4fb   :  { %v1730_v58 = vsub.f32 %v906_v40, %v934_v56 }
 0x4fd   :  { %v939_v59 = vmul.f32 1.442695, %v1730_v58 }
 0x4ff   :  { %1432 = vpow2.f32 %v939_v59 }
 0x500   :  { %1434 = vpow2.f32 %v921_v60 }
 0x501   :  { %1436 = vpow2.f32 %v941_v61 }
 0x505   :  { %1343 = vrot.lane.b32.xlu0 %v1342_v63, %s1453_s4 }
 0x50c   :  { %v1433_v1 = vpop.eup %1432 }
 0x50d   :  { %943 = vadd.xlane.f32.xlu1 %v1433_v1  ;;  %v1435_v2 = vpop.eup %1434 }
 0x50e   :  { %v1437_v4 = vpop.eup %1436 }
 0x511   :  { %925 = vadd.xlane.f32.xlu1 %v1435_v2 }
 0x515   :  { %945 = vadd.xlane.f32.xlu1 %v1437_v4 }
 0x568   :  { %v924_v5 = vpop.xlane.xlu1 %923 }
 0x569   :  { %1438 = vlog2.f32 %v924_v5 }
 0x574   :  { %v964_v6 = vpop.xlane.xlu1 %963 }
 0x575   :  { %1440 = vlog2.f32 %v964_v6 }
 0x576   :  { %v1439_v8 = vpop.eup %1438 }
 0x577   :  { %v928_v9 = vmul.f32 0.6931472, %v1439_v8 }
 0x578   :  { %v966_v10 = vpop.xlane.xlu0 %965 }
 0x579   :  { %v931_v12 = vsub.f32 %v917_v44, %v928_v9  ;;  %1442 = vlog2.f32 %v966_v10 }
 0x57b   :  { %973 = vst [vmem:[%s1789_s9] sm:$0xff] %v931_v12 }
 0x57c   :  { %v1344_v47 = vpop.permute.xlu0 %1343 }
 0x57d   :  { %v1345_v52 = vunpack.i.l.bf16 %v1344_v47 }
 0x581   :  { %v1042_v13 = vpop.f32.mrf.mxu0 }
 0x582   :  { %v1441_v14 = vpop.eup %1440  ;;  %v1043_v23 = vadd.f32 %v1260_v16, %v1042_v13 }
 0x583   :  { %v968_v15 = vmul.f32 0.6931472, %v1441_v14  ;;  %v1322_v17 = vpop.f32.mrf.mxu0 }
 0x585   :  { %v971_v18 = vsub.f32 %v957_v49, %v968_v15  ;;  %v1045_v20 = vpop.f32.mrf.mxu0  ;;  %v1103_v21 = vpop.f32.mrf.mxu1 }
 0x586   :  { %v1443_v22 = vpop.eup %1442  ;;  %v1046_v24 = vadd.f32 %v1260_v16, %v1045_v20  ;;  %v1104_v30 = vadd.f32 %v1263_v7, %v1103_v21 }
 0x587   :  { %975 = vst [vmem:[%s1789_s9 + $0x10] sm:$0xff] %v971_v18  ;;  %v970_v25 = vmul.f32 0.6931472, %v1443_v22  ;;  %v1323_v26 = vpop.f32.mrf.mxu0  ;;  %v1328_v27 = vpop.f32.mrf.mxu1 }
 0x588   :  { %v1337_v28 = vpack.i.bf16 %v1046_v24, %v1043_v23 }
 0x589   :  { %v972_v29 = vsub.f32 %v1725_v38, %v970_v25  ;;  %v1106_v62 = vpop.f32.mrf.mxu1  ;;  %v1346_v38 = vunpack.i.h.bf16 %v1344_v47 }
 0x58a   :  { %v1107_v19 = vadd.f32 %v1263_v7, %v1106_v62  ;;  %1338 = vrot.lane.b32.xlu1 %v1337_v28, %s1455_s6 }
 0x58b   :  { %978 = vst [vmem:[%s1789_s9 + $0x28] sm:$0xff] %v972_v29  ;;  %v1329_v31 = vpop.f32.mrf.mxu1 }
 0x58c   :  { %v1347_v32 = vpack.i.bf16 %v1107_v19, %v1104_v30 }
 0x58e   :  { %1348 = vrot.lane.b32.xlu1 %v1347_v32, %s1456_s11 }
 0x596   :  { %v944_v33 = vpop.xlane.xlu1 %943 }
 0x597   :  { %1444 = vlog2.f32 %v944_v33 }
 0x59a   :  { %v926_v3 = vpop.xlane.xlu1 %925 }
 0x59b   :  { %1446 = vlog2.f32 %v926_v3 }
 0x59e   :  { %v946_v36 = vpop.xlane.xlu1 %945 }
 0x59f   :  { %1448 = vlog2.f32 %v946_v36 }
 0x5a4   :  { %v1445_v37 = vpop.eup %1444 }
 0x5a5   :  { %v948_v39 = vmul.f32 0.6931472, %v1445_v37 }
 0x5a7   :  { %v951_v11 = vsub.f32 %v1730_v58, %v948_v39 }
 0x5a8   :  { %v1447_v40 = vpop.eup %1446 }
 0x5a9   :  { %974 = vst [vmem:[%s1789_s9 + $0x8] sm:$0xff] %v951_v11  ;;  %v930_v41 = vmul.f32 0.6931472, %v1447_v40 }
 0x5ab   :  { %v932_v42 = vsub.f32 %v1728_v57, %v930_v41 }
 0x5ac   :  { %v1449_v43 = vpop.eup %1448 }
 0x5ad   :  { %976 = vst [vmem:[%s1789_s9 + $0x18] sm:$0xff] %v932_v42  ;;  %v950_v44 = vmul.f32 0.6931472, %v1449_v43 }
 0x5af   :  { %v952_v45 = vsub.f32 %v1734_v0, %v950_v44 }
 0x5b1   :  { %977 = vst [vmem:[%s1789_s9 + $0x20] sm:$0xff] %v952_v45 }
 0x5fc   :  { %v1339_v46 = vpop.permute.xlu1 %1338 }
 0x5fd   :  { %v1341_v48 = vunpack.i.h.bf16 %v1339_v46  ;;  %v1340_v49 = vunpack.i.l.bf16 %v1339_v46 }
 0x5ff   :  { %v1135_v50 = vsel %vm1004_vm4, %v1717_v35, %v1341_v48  ;;  %v1134_v51 = vsel %vm1004_vm4, %v1715_v34, %v1340_v49 }
 0x600   :  { %v1349_v53 = vpop.permute.xlu1 %1348  ;;  %v1136_v56 = vsel %vm61_vm1, %v1134_v51, %v1345_v52  ;;  %v1137_v57 = vsel %vm61_vm1, %v1135_v50, %v1346_v38 }
 0x601   :  { %v1351_v54 = vunpack.i.h.bf16 %v1349_v53  ;;  %v1350_v55 = vunpack.i.l.bf16 %v1349_v53 }
 0x603   :  { %v1142_v58 = vsel %vm1004_vm4, %v1351_v54, 0.0  ;;  %v1139_v59 = vsel %vm1138_vm5, %v1136_v56, %v1350_v55  ;;  %v1140_v60 = vsel %vm1138_vm5, %v1137_v57, %v1351_v54  ;;  %v1141_v0 = vsel %vm1004_vm4, %v1350_v55, 0.0 }
 0x604   :  { %v1268_v35 = vpack.c.bf16 %v1141_v0, %v1139_v59  ;;  %v1269_v61 = vpack.c.bf16 %v1142_v58, %v1140_v60 }
 0x606   :  { %1155 = vst [vmem:[%s1792_s10] sm:$0xff] %v1268_v35  ;;  %1156 = vst [vmem:[%s1792_s10 + $0x8] sm:$0xff] %v1269_v61 }

</bundles_post_ra>
